<compile_context>
chip_gen: v5e
topology: v5e:2x2
jax: 0.10.0
libtpu: 0.0.40
codegen_flags: <defaults>
</compile_context>

<pallas_src>
import functools

import jax
import jax.numpy as jnp
import numpy as np
from jax.experimental import pallas as pl
from jax.experimental.pallas import tpu as pltpu

EPS = 1e-5  # PyTorch nn.LayerNorm default eps


def _ln(y, g, b):
    """LayerNorm over the last dim (biased variance, matches nn.LayerNorm)."""
    m = jnp.mean(y, axis=-1, keepdims=True)
    v = jnp.mean((y - m) ** 2, axis=-1, keepdims=True)
    return (y - m) * jax.lax.rsqrt(v + EPS) * g + b


# ---------------------------------------------------------------------------
# Kernel 1: seq LayerNorm + fused left/right Linear(E -> 2*C1) + LayerNorm(C1)
# ---------------------------------------------------------------------------
def _seq_proj_kernel(x_ref, gs_ref, bs_ref, wlr_ref, blr_ref,
                     gl_ref, bl_ref, gr_ref, br_ref,
                     left_ref, right_ref, *, C1):
    x = x_ref[...]                                    # (TM, E)
    xn = _ln(x, gs_ref[...], bs_ref[...])             # layer_norm_seq
    # Single fused matmul for both projections (doubles MXU column occupancy,
    # one weight push, one read of xn).
    y = jnp.dot(xn, wlr_ref[...], preferred_element_type=jnp.float32) + blr_ref[...]
    left_ref[...] = _ln(y[:, :C1], gl_ref[...], bl_ref[...])    # proj_1D_left
    right_ref[...] = _ln(y[:, C1:], gr_ref[...], br_ref[...])   # proj_1D_right


# ---------------------------------------------------------------------------
# Kernel 2: fused outer product + re-layout + proj_layer + residual add
# ---------------------------------------------------------------------------
def _cov_proj_kernel(left_ref, right_ref, w2_ref, b2_ref, prev_ref,
                     out_ref, opr_ref, *, TI, TJ, C1):
    lb = left_ref[0]                                  # (N, TI*C1)
    rb = right_ref[0]                                 # (N, TJ*C1)
    # Outer-product tile: contract over the seq dim (dim 0 of both operands).
    op = jax.lax.dot_general(
        lb, rb, (((0,), (0,)), ((), ())),
        preferred_element_type=jnp.float32)           # (TI*C1, TJ*C1)

    # Re-layout [(ti,l), (tj,r)] -> scratch rows (ti*TJ+tj)*C1 + l, lanes r.
    # Done entirely in VMEM so the big op tensor never goes back to HBM.
    for ti in range(TI):
        for tj in range(TJ):
            k = ti * TJ + tj
            opr_ref[k * C1:(k + 1) * C1, :] = (
                op[ti * C1:(ti + 1) * C1, tj * C1:(tj + 1) * C1])

    # proj_layer: out[(ti,tj), c] = sum_l sum_r opr[(ti,tj), l, r] * w2[l*C1+r, c]
    M = TI * TJ
    C2 = out_ref.shape[-1]
    acc = jnp.zeros((M, C2), jnp.float32)
    for l in range(C1):
        v_l = opr_ref[pl.ds(l, M, stride=C1), :]      # (M, C1): rows = (ti,tj)
        acc = acc + jnp.dot(v_l, w2_ref[l * C1:(l + 1) * C1, :],
                            preferred_element_type=jnp.float32)

    bias = b2_ref[...]                                # (1, C2)
    for ti in range(TI):
        out_ref[0, ti] = acc[ti * TJ:(ti + 1) * TJ, :] + bias + prev_ref[0, ti]


# ---------------------------------------------------------------------------
# Tile-size helpers
# ---------------------------------------------------------------------------
def _row_tile(R, target=512):
    if R >= target:
        return target
    return ((R + 7) // 8) * 8


def _res_tile(L, target=8):
    # Residue-tile for the fused cov kernel: must divide L and be a multiple
    # of 8 (sublane constraint of the (TI, TJ, C2) output block), else use L.
    for t in range(min(target, L), 0, -1):
        if L % t == 0 and t % 8 == 0:
            return t
    return L


# ---------------------------------------------------------------------------
# seq_to_pair forward (Pallas)
# ---------------------------------------------------------------------------
def seq_to_pair_pallas(params, x, pair_feat_prev):
    B, N, L, E = x.shape
    C1 = params['wl'].shape[1]
    C2 = params['w2'].shape[1]
    R = B * N * L

    # Fold the two projections into one matmul (host-side, tiny tensors).
    w_lr = jnp.concatenate([params['wl'], params['wr']], axis=1)   # (E, 2*C1)
    b_lr = jnp.concatenate([params['bl'], params['br']], axis=1)   # (1, 2*C1)

    # ---- kernel 1: row-tiled LayerNorm + projections -----------------------
    TM = _row_tile(R)
    x2 = x.reshape(R, E)
    row_spec = lambda shape: pl.BlockSpec(shape, lambda i: (i, 0))
    const_spec = lambda shape: pl.BlockSpec(shape, lambda i: (0, 0))
    left2, right2 = pl.pallas_call(
        functools.partial(_seq_proj_kernel, C1=C1),
        out_shape=(jax.ShapeDtypeStruct((R, C1), jnp.float32),
                   jax.ShapeDtypeStruct((R, C1), jnp.float32)),
        grid=(pl.cdiv(R, TM),),
        in_specs=[row_spec((TM, E)),
                  const_spec((1, E)), const_spec((1, E)),
                  const_spec((E, 2 * C1)), const_spec((1, 2 * C1)),
                  const_spec((1, C1)), const_spec((1, C1)),
                  const_spec((1, C1)), const_spec((1, C1))],
        out_specs=(row_spec((TM, C1)), row_spec((TM, C1))),
        compiler_params=pltpu.CompilerParams(
            dimension_semantics=("parallel",),
            vmem_limit_bytes=32 * 1024 * 1024),
    )(x2, params['g_seq'], params['b_seq'], w_lr, b_lr,
      params['gl'], params['b_ll'], params['gr'], params['b_rl'])

    # Lane-dense per-batch layout for the fused cov kernel (free reshapes:
    # contiguity is preserved, no host transpose of left/right is needed).
    left_r = left2.reshape(B, N, L * C1)
    right_r = right2.reshape(B, N, L * C1)

    # ---- kernel 2: fused outer product + projection + residual -------------
    TI = TJ = _res_tile(L)
    flops = 2 * B * L * L * C1 * C1 * (N + C2)
    bytes_accessed = 4 * (2 * B * N * L * C1 + C1 * C1 * C2 + 2 * B * L * L * C2)
    # NOTE: input_output_aliases={4: 0} (prev -> out) would additionally save
    # one HBM output allocation; omitted to keep the un-jitted test simple.
    out = pl.pallas_call(
        functools.partial(_cov_proj_kernel, TI=TI, TJ=TJ, C1=C1),
        out_shape=jax.ShapeDtypeStruct((B, L, L, C2), jnp.float32),
        grid=(B, L // TI, L // TJ),
        in_specs=[
            pl.BlockSpec((1, N, TI * C1), lambda b, i, j: (b, 0, i)),
            pl.BlockSpec((1, N, TJ * C1), lambda b, i, j: (b, 0, j)),
            pl.BlockSpec((C1 * C1, C2), lambda b, i, j: (0, 0)),
            pl.BlockSpec((1, C2), lambda b, i, j: (0, 0)),
            pl.BlockSpec((1, TI, TJ, C2), lambda b, i, j: (b, i, j, 0)),
        ],
        out_specs=pl.BlockSpec((1, TI, TJ, C2), lambda b, i, j: (b, i, j, 0)),
        scratch_shapes=[pltpu.VMEM((TI * TJ * C1, C1), jnp.float32)],
        compiler_params=pltpu.CompilerParams(
            dimension_semantics=("parallel", "parallel", "parallel"),
            vmem_limit_bytes=32 * 1024 * 1024),
        cost_estimate=pl.CostEstimate(flops=flops, transcendentals=0,
                                      bytes_accessed=bytes_accessed),
    )(left_r, right_r, params['w2'], params['b2'], pair_feat_prev)

    return out


# ---------------------------------------------------------------------------
# PairUpdateLayer forward
# ---------------------------------------------------------------------------
def pair_update_layer_forward(params, x, pair_feat, res_mask):
    pair_feat = seq_to_pair_pallas(params, x, pair_feat)
    # TODO(synk): TriangleMultiplication, MHSelfAttention (triangle attention),
    # FeedForward and Residual class definitions were not provided in the
    # reference source, so those stages (the ones consuming res_mask) are not
    # implemented here.
    return pair_feat


# ---------------------------------------------------------------------------
# Pure-JAX reference for the implemented (seq_to_pair) path
# ---------------------------------------------------------------------------
def seq_to_pair_reference(params, x, prev):
    B, N, L, E = x.shape
    xn = _ln(x, params['g_seq'], params['b_seq'])
    left = _ln(xn @ params['wl'] + params['bl'], params['gl'], params['b_ll'])
    right = _ln(xn @ params['wr'] + params['br'], params['gr'], params['b_rl'])
    op = jnp.einsum('bnil,bnjr->bijlr', left, right).reshape(B, L, L, -1)
    return op @ params['w2'] + params['b2'] + prev


def init_params(key, E, C1, C2):
    k0, k1, k2, k3, k4, k5 = jax.random.split(key, 6)
    nrm = lambda k, shape, s: jax.random.normal(k, shape, jnp.float32) * s
    return {
        # nn.LayerNorm(emb_dim)
        'g_seq': jnp.ones((1, E), jnp.float32),
        'b_seq': jnp.zeros((1, E), jnp.float32),
        # proj_1D_left: Linear(E, C1) (+ LayerNorm(C1))
        'wl': nrm(k0, (E, C1), 0.05), 'bl': nrm(k1, (1, C1), 0.02),
        'gl': jnp.ones((1, C1), jnp.float32), 'b_ll': jnp.zeros((1, C1), jnp.float32),
        # proj_1D_right: Linear(E, C1) (+ LayerNorm(C1))
        'wr': nrm(k2, (E, C1), 0.05), 'br': nrm(k3, (1, C1), 0.02),
        'gr': jnp.ones((1, C1), jnp.float32), 'b_rl': jnp.zeros((1, C1), jnp.float32),
        # CovLayer.proj_layer: Linear(C1*C1, C2)
        'w2': nrm(k4, (C1 * C1, C2), 0.03), 'b2': nrm(k5, (1, C2), 0.02),
    }


if __name__ == "__main__":
    # Small shapes consistent with the module: emb_dim=256, n_emb_1D=32,
    # n_emb_2D=128 are hard-coded in seq_to_pair(); batch=2, seq_num=8, n_res=8.
    B, N, L, E, C1, C2 = 2, 8, 8, 256, 32, 128

    key = jax.random.PRNGKey(0)
    kx, kp, kw = jax.random.split(key, 3)
    x = jax.random.normal(kx, (B, N, L, E), jnp.float32)
    pair_feat_prev = jax.random.normal(kp, (B, L, L, C2), jnp.float32)
    res_mask = jnp.ones((B, L), jnp.float32)
    params = init_params(kw, E, C1, C2)

    out = pair_update_layer_forward(params, x, pair_feat_prev, res_mask)
    out = jax.block_until_ready(out)

    ref = seq_to_pair_reference(params, x, pair_feat_prev)
    np.testing.assert_allclose(np.asarray(out), np.asarray(ref),
                               rtol=2e-4, atol=2e-4)
    print("KERNEL_OK")
</pallas_src>

<mosaic_0001>
module attributes {stable_mosaic.version = 11 : i64} {
  func.func @_seq_proj_kernel(%arg0: i32, %arg1: memref<128x256xf32, #tpu.memory_space<vmem>>, %arg2: memref<1x256xf32, #tpu.memory_space<vmem>>, %arg3: memref<1x256xf32, #tpu.memory_space<vmem>>, %arg4: memref<256x64xf32, #tpu.memory_space<vmem>>, %arg5: memref<1x64xf32, #tpu.memory_space<vmem>>, %arg6: memref<1x32xf32, #tpu.memory_space<vmem>>, %arg7: memref<1x32xf32, #tpu.memory_space<vmem>>, %arg8: memref<1x32xf32, #tpu.memory_space<vmem>>, %arg9: memref<1x32xf32, #tpu.memory_space<vmem>>, %arg10: memref<128x32xf32, #tpu.memory_space<vmem>>, %arg11: memref<128x32xf32, #tpu.memory_space<vmem>>) attributes {dimension_semantics = [#tpu.dimension_semantics<parallel>], iteration_bounds = array<i64: 1>, scalar_prefetch = 0 : i64, scratch_operands = 0 : i64, tpu.core_type = #tpu.core_type<tc>, window_params = [{transform_indices = @transform_0, window_bounds = array<i64: 128, 256>}, {pipeline_mode = #tpu.pipeline_mode<synchronous>, transform_indices = @transform_1, window_bounds = array<i64: 1, 256>}, {pipeline_mode = #tpu.pipeline_mode<synchronous>, transform_indices = @transform_2, window_bounds = array<i64: 1, 256>}, {pipeline_mode = #tpu.pipeline_mode<synchronous>, transform_indices = @transform_3, window_bounds = array<i64: 256, 64>}, {pipeline_mode = #tpu.pipeline_mode<synchronous>, transform_indices = @transform_4, window_bounds = array<i64: 1, 64>}, {pipeline_mode = #tpu.pipeline_mode<synchronous>, transform_indices = @transform_5, window_bounds = array<i64: 1, 32>}, {pipeline_mode = #tpu.pipeline_mode<synchronous>, transform_indices = @transform_6, window_bounds = array<i64: 1, 32>}, {pipeline_mode = #tpu.pipeline_mode<synchronous>, transform_indices = @transform_7, window_bounds = array<i64: 1, 32>}, {pipeline_mode = #tpu.pipeline_mode<synchronous>, transform_indices = @transform_8, window_bounds = array<i64: 1, 32>}, {transform_indices = @transform_9, window_bounds = array<i64: 128, 32>}, {transform_indices = @transform_10, window_bounds = array<i64: 128, 32>}]} {
    %c0 = arith.constant 0 : index
    %c0_0 = arith.constant 0 : index
    %0 = vector.load %arg1[%c0, %c0_0] : memref<128x256xf32, #tpu.memory_space<vmem>>, vector<128x256xf32>
    %c0_1 = arith.constant 0 : index
    %c0_2 = arith.constant 0 : index
    %1 = vector.load %arg2[%c0_1, %c0_2] : memref<1x256xf32, #tpu.memory_space<vmem>>, vector<1x256xf32>
    %c0_3 = arith.constant 0 : index
    %c0_4 = arith.constant 0 : index
    %2 = vector.load %arg3[%c0_3, %c0_4] : memref<1x256xf32, #tpu.memory_space<vmem>>, vector<1x256xf32>
    %cst = arith.constant dense<0.000000e+00> : vector<128xf32>
    %3 = vector.multi_reduction <add>, %0, %cst [1] : vector<128x256xf32> to vector<128xf32>
    %4 = vector.shape_cast %3 : vector<128xf32> to vector<128x1xf32>
    %cst_5 = arith.constant 2.560000e+02 : f32
    %5 = vector.broadcast %cst_5 : f32 to vector<128x1xf32>
    %6 = arith.divf %4, %5 : vector<128x1xf32>
    %7 = vector.broadcast %6 : vector<128x1xf32> to vector<128x256xf32>
    %8 = arith.subf %0, %7 : vector<128x256xf32>
    %9 = arith.mulf %8, %8 : vector<128x256xf32>
    %cst_6 = arith.constant dense<0.000000e+00> : vector<128xf32>
    %10 = vector.multi_reduction <add>, %9, %cst_6 [1] : vector<128x256xf32> to vector<128xf32>
    %11 = vector.shape_cast %10 : vector<128xf32> to vector<128x1xf32>
    %cst_7 = arith.constant 2.560000e+02 : f32
    %12 = vector.broadcast %cst_7 : f32 to vector<128x1xf32>
    %13 = arith.divf %11, %12 : vector<128x1xf32>
    %14 = vector.broadcast %6 : vector<128x1xf32> to vector<128x256xf32>
    %15 = arith.subf %0, %14 : vector<128x256xf32>
    %cst_8 = arith.constant 9.99999974E-6 : f32
    %16 = vector.broadcast %cst_8 : f32 to vector<128x1xf32>
    %17 = arith.addf %13, %16 : vector<128x1xf32>
    %18 = math.rsqrt %17 : vector<128x1xf32>
    %19 = vector.broadcast %18 : vector<128x1xf32> to vector<128x256xf32>
    %20 = arith.mulf %15, %19 : vector<128x256xf32>
    %21 = vector.broadcast %1 : vector<1x256xf32> to vector<128x256xf32>
    %22 = arith.mulf %20, %21 : vector<128x256xf32>
    %23 = vector.broadcast %2 : vector<1x256xf32> to vector<128x256xf32>
    %24 = arith.addf %22, %23 : vector<128x256xf32>
    %c0_9 = arith.constant 0 : index
    %c0_10 = arith.constant 0 : index
    %25 = vector.load %arg4[%c0_9, %c0_10] : memref<256x64xf32, #tpu.memory_space<vmem>>, vector<256x64xf32>
    %cst_11 = arith.constant dense<0.000000e+00> : vector<128x64xf32>
    %26 = tpu.matmul %24, %25, %cst_11 {dimension_numbers = #tpu.dot_dimension_numbers<[1], [0], [0], [1], [0, 0, 1, 1], [], []>} : vector<128x256xf32>, vector<256x64xf32>, vector<128x64xf32> -> vector<128x64xf32>
    %c0_12 = arith.constant 0 : index
    %c0_13 = arith.constant 0 : index
    %27 = vector.load %arg5[%c0_12, %c0_13] : memref<1x64xf32, #tpu.memory_space<vmem>>, vector<1x64xf32>
    %28 = vector.broadcast %27 : vector<1x64xf32> to vector<128x64xf32>
    %29 = arith.addf %26, %28 : vector<128x64xf32>
    %30 = vector.extract_strided_slice %29 {offsets = [0, 0], sizes = [128, 32], strides = [1, 1]} : vector<128x64xf32> to vector<128x32xf32>
    %c0_14 = arith.constant 0 : index
    %c0_15 = arith.constant 0 : index
    %31 = vector.load %arg6[%c0_14, %c0_15] : memref<1x32xf32, #tpu.memory_space<vmem>>, vector<1x32xf32>
    %c0_16 = arith.constant 0 : index
    %c0_17 = arith.constant 0 : index
    %32 = vector.load %arg7[%c0_16, %c0_17] : memref<1x32xf32, #tpu.memory_space<vmem>>, vector<1x32xf32>
    %cst_18 = arith.constant dense<0.000000e+00> : vector<128xf32>
    %33 = vector.multi_reduction <add>, %30, %cst_18 [1] : vector<128x32xf32> to vector<128xf32>
    %34 = vector.shape_cast %33 : vector<128xf32> to vector<128x1xf32>
    %cst_19 = arith.constant 3.200000e+01 : f32
    %35 = vector.broadcast %cst_19 : f32 to vector<128x1xf32>
    %36 = arith.divf %34, %35 : vector<128x1xf32>
    %37 = vector.broadcast %36 : vector<128x1xf32> to vector<128x32xf32>
    %38 = arith.subf %30, %37 : vector<128x32xf32>
    %39 = arith.mulf %38, %38 : vector<128x32xf32>
    %cst_20 = arith.constant dense<0.000000e+00> : vector<128xf32>
    %40 = vector.multi_reduction <add>, %39, %cst_20 [1] : vector<128x32xf32> to vector<128xf32>
    %41 = vector.shape_cast %40 : vector<128xf32> to vector<128x1xf32>
    %cst_21 = arith.constant 3.200000e+01 : f32
    %42 = vector.broadcast %cst_21 : f32 to vector<128x1xf32>
    %43 = arith.divf %41, %42 : vector<128x1xf32>
    %44 = vector.broadcast %36 : vector<128x1xf32> to vector<128x32xf32>
    %45 = arith.subf %30, %44 : vector<128x32xf32>
    %cst_22 = arith.constant 9.99999974E-6 : f32
    %46 = vector.broadcast %cst_22 : f32 to vector<128x1xf32>
    %47 = arith.addf %43, %46 : vector<128x1xf32>
    %48 = math.rsqrt %47 : vector<128x1xf32>
    %49 = vector.broadcast %48 : vector<128x1xf32> to vector<128x32xf32>
    %50 = arith.mulf %45, %49 : vector<128x32xf32>
    %51 = vector.broadcast %31 : vector<1x32xf32> to vector<128x32xf32>
    %52 = arith.mulf %50, %51 : vector<128x32xf32>
    %53 = vector.broadcast %32 : vector<1x32xf32> to vector<128x32xf32>
    %54 = arith.addf %52, %53 : vector<128x32xf32>
    %c0_23 = arith.constant 0 : index
    %c0_24 = arith.constant 0 : index
    %55 = vector.load %arg10[%c0_23, %c0_24] : memref<128x32xf32, #tpu.memory_space<vmem>>, vector<128x32xf32>
    tpu.vector_store %arg10[%c0_23, %c0_24], %54 {strides = array<i32>} : memref<128x32xf32, #tpu.memory_space<vmem>>, vector<128x32xf32>,
    %56 = vector.extract_strided_slice %29 {offsets = [0, 32], sizes = [128, 32], strides = [1, 1]} : vector<128x64xf32> to vector<128x32xf32>
    %c0_25 = arith.constant 0 : index
    %c0_26 = arith.constant 0 : index
    %57 = vector.load %arg8[%c0_25, %c0_26] : memref<1x32xf32, #tpu.memory_space<vmem>>, vector<1x32xf32>
    %c0_27 = arith.constant 0 : index
    %c0_28 = arith.constant 0 : index
    %58 = vector.load %arg9[%c0_27, %c0_28] : memref<1x32xf32, #tpu.memory_space<vmem>>, vector<1x32xf32>
    %cst_29 = arith.constant dense<0.000000e+00> : vector<128xf32>
    %59 = vector.multi_reduction <add>, %56, %cst_29 [1] : vector<128x32xf32> to vector<128xf32>
    %60 = vector.shape_cast %59 : vector<128xf32> to vector<128x1xf32>
    %cst_30 = arith.constant 3.200000e+01 : f32
    %61 = vector.broadcast %cst_30 : f32 to vector<128x1xf32>
    %62 = arith.divf %60, %61 : vector<128x1xf32>
    %63 = vector.broadcast %62 : vector<128x1xf32> to vector<128x32xf32>
    %64 = arith.subf %56, %63 : vector<128x32xf32>
    %65 = arith.mulf %64, %64 : vector<128x32xf32>
    %cst_31 = arith.constant dense<0.000000e+00> : vector<128xf32>
    %66 = vector.multi_reduction <add>, %65, %cst_31 [1] : vector<128x32xf32> to vector<128xf32>
    %67 = vector.shape_cast %66 : vector<128xf32> to vector<128x1xf32>
    %cst_32 = arith.constant 3.200000e+01 : f32
    %68 = vector.broadcast %cst_32 : f32 to vector<128x1xf32>
    %69 = arith.divf %67, %68 : vector<128x1xf32>
    %70 = vector.broadcast %62 : vector<128x1xf32> to vector<128x32xf32>
    %71 = arith.subf %56, %70 : vector<128x32xf32>
    %cst_33 = arith.constant 9.99999974E-6 : f32
    %72 = vector.broadcast %cst_33 : f32 to vector<128x1xf32>
    %73 = arith.addf %69, %72 : vector<128x1xf32>
    %74 = math.rsqrt %73 : vector<128x1xf32>
    %75 = vector.broadcast %74 : vector<128x1xf32> to vector<128x32xf32>
    %76 = arith.mulf %71, %75 : vector<128x32xf32>
    %77 = vector.broadcast %57 : vector<1x32xf32> to vector<128x32xf32>
    %78 = arith.mulf %76, %77 : vector<128x32xf32>
    %79 = vector.broadcast %58 : vector<1x32xf32> to vector<128x32xf32>
    %80 = arith.addf %78, %79 : vector<128x32xf32>
    %c0_34 = arith.constant 0 : index
    %c0_35 = arith.constant 0 : index
    %81 = vector.load %arg11[%c0_34, %c0_35] : memref<128x32xf32, #tpu.memory_space<vmem>>, vector<128x32xf32>
    tpu.vector_store %arg11[%c0_34, %c0_35], %80 {strides = array<i32>} : memref<128x32xf32, #tpu.memory_space<vmem>>, vector<128x32xf32>,
    return
  }
  func.func @transform_0(%arg0: i32) -> (i32, i32) {
    %c0_i32 = arith.constant 0 : i32
    %c0_i32_0 = arith.constant 0 : i32
    return %arg0, %c0_i32 : i32, i32
  }
  func.func @transform_1(%arg0: i32) -> (i32, i32) {
    %c0_i32 = arith.constant 0 : i32
    %c0_i32_0 = arith.constant 0 : i32
    %c0_i32_1 = arith.constant 0 : i32
    return %c0_i32, %c0_i32_0 : i32, i32
  }
  func.func @transform_2(%arg0: i32) -> (i32, i32) {
    %c0_i32 = arith.constant 0 : i32
    %c0_i32_0 = arith.constant 0 : i32
    %c0_i32_1 = arith.constant 0 : i32
    return %c0_i32, %c0_i32_0 : i32, i32
  }
  func.func @transform_3(%arg0: i32) -> (i32, i32) {
    %c0_i32 = arith.constant 0 : i32
    %c0_i32_0 = arith.constant 0 : i32
    %c0_i32_1 = arith.constant 0 : i32
    return %c0_i32, %c0_i32_0 : i32, i32
  }
  func.func @transform_4(%arg0: i32) -> (i32, i32) {
    %c0_i32 = arith.constant 0 : i32
    %c0_i32_0 = arith.constant 0 : i32
    %c0_i32_1 = arith.constant 0 : i32
    return %c0_i32, %c0_i32_0 : i32, i32
  }
  func.func @transform_5(%arg0: i32) -> (i32, i32) {
    %c0_i32 = arith.constant 0 : i32
    %c0_i32_0 = arith.constant 0 : i32
    %c0_i32_1 = arith.constant 0 : i32
    return %c0_i32, %c0_i32_0 : i32, i32
  }
  func.func @transform_6(%arg0: i32) -> (i32, i32) {
    %c0_i32 = arith.constant 0 : i32
    %c0_i32_0 = arith.constant 0 : i32
    %c0_i32_1 = arith.constant 0 : i32
    return %c0_i32, %c0_i32_0 : i32, i32
  }
  func.func @transform_7(%arg0: i32) -> (i32, i32) {
    %c0_i32 = arith.constant 0 : i32
    %c0_i32_0 = arith.constant 0 : i32
    %c0_i32_1 = arith.constant 0 : i32
    return %c0_i32, %c0_i32_0 : i32, i32
  }
  func.func @transform_8(%arg0: i32) -> (i32, i32) {
    %c0_i32 = arith.constant 0 : i32
    %c0_i32_0 = arith.constant 0 : i32
    %c0_i32_1 = arith.constant 0 : i32
    return %c0_i32, %c0_i32_0 : i32, i32
  }
  func.func @transform_9(%arg0: i32) -> (i32, i32) {
    %c0_i32 = arith.constant 0 : i32
    %c0_i32_0 = arith.constant 0 : i32
    return %arg0, %c0_i32 : i32, i32
  }
  func.func @transform_10(%arg0: i32) -> (i32, i32) {
    %c0_i32 = arith.constant 0 : i32
    %c0_i32_0 = arith.constant 0 : i32
    return %arg0, %c0_i32 : i32, i32
  }
}

</mosaic_0001>

<bundles_post_ra>
// kernel: tpu_custom_call.1
= control target key start
LH: loop header
LB: loop body
LE: loop exit
PB: predicated region body
PF: predicated region fallthrough
CT: control target
= control target key end

     0   :  { %s1884_s21 = smov 32   ;;  %v1885_v50 = vmov 256.0   ;;  %s1886_s20 = smov 96   ;;  %s3715_s0 = inlined_call_operand.vmem [shape: f32[128,256], index: 0, kind: input, shape index: {}]   ;;  %s3716_s8 = inlined_call_operand.vmem [shape: f32[1,32], index: 8, kind: input, shape index: {}]   ;;  %s3717_s7 = inlined_call_operand.vmem [shape: f32[1,32], index: 7, kind: input, shape index: {}]   ;;  %s3718_s3 = inlined_call_operand.vmem [shape: f32[256,64], index: 3, kind: input, shape index: {}]   ;;  %s3719_s4 = inlined_call_operand.vmem [shape: f32[1,64], index: 4, kind: input, shape index: {}]   ;;  %s3720_s1 = inlined_call_operand.vmem [shape: f32[1,256], index: 1, kind: input, shape index: {}]   ;;  %s3721_s2 = inlined_call_operand.vmem [shape: f32[1,256], index: 2, kind: input, shape index: {}]   ;;  %s3722_s5 = inlined_call_operand.vmem [shape: f32[1,32], index: 5, kind: input, shape index: {}]   ;;  %s3723_s6 = inlined_call_operand.vmem [shape: f32[1,32], index: 6, kind: input, shape index: {}]   ;;  %s3724_s9 = inlined_call_operand.vmem [shape: f32[128,32], index: 9, kind: output, shape index: {0}]   ;;  %s3725_s10 = inlined_call_operand.vmem [shape: f32[128,32], index: 10, kind: output, shape index: {1}]  }
   0x1   :  { %v1946_v0 = vld [vmem:[%s3715_s0 + $0xa0] sm:$0xff]  ;;  %v1951_v1 = vld [vmem:[%s3715_s0 + $0xa8] sm:$0xff]  ;;  %v1956_v2 = vld [vmem:[%s3715_s0 + $0x90] sm:$0xff]  ;;  %1784 = vrcp.f32 %v1885_v50 }
   0x2   :  { %v98_v3 = vadd.f32 %v1951_v1, %v1946_v0  ;;  %v1963_v4 = vld [vmem:[%s3715_s0 + $0x98] sm:$0xff]  ;;  %v1968_v5 = vld [vmem:[%s3715_s0 + $0x80] sm:$0xff]  ;;  %v1973_v6 = vld [vmem:[%s3715_s0 + $0x88] sm:$0xff] }
   0x3   :  { %v95_v7 = vadd.f32 %v1963_v4, %v1956_v2  ;;  %v92_v8 = vadd.f32 %v1973_v6, %v1968_v5  ;;  %v1982_v9 = vld [vmem:[%s3715_s0 + $0x20] sm:$0xff]  ;;  %v1987_v10 = vld [vmem:[%s3715_s0 + $0x28] sm:$0xff]  ;;  %v1992_v11 = vld [vmem:[%s3715_s0 + $0x10] sm:$0xff] }
   0x4   :  { %99 = vadd.xlane.f32.xlu2 %v98_v3  ;;  %v1997_v12 = vld [vmem:[%s3715_s0 + $0x18] sm:$0xff]  ;;  %v2002_v13 = vld [vmem:[%s3715_s0] sm:$0xff]  ;;  %v2007_v14 = vld [vmem:[%s3715_s0 + $0x8] sm:$0xff]  ;;  %v74_v15 = vadd.f32 %v1987_v10, %v1982_v9 }
   0x5   :  { %96 = vadd.xlane.f32.xlu1 %v95_v7  ;;  %93 = vadd.xlane.f32.xlu0 %v92_v8  ;;  %v71_v16 = vadd.f32 %v1997_v12, %v1992_v11  ;;  %v68_v17 = vadd.f32 %v2007_v14, %v2002_v13  ;;  %v2018_v18 = vld [vmem:[%s3715_s0 + $0xc0] sm:$0xff]  ;;  %v2023_v19 = vld [vmem:[%s3715_s0 + $0xc8] sm:$0xff]  ;;  %v2028_v20 = vld [vmem:[%s3715_s0 + $0x30] sm:$0xff] }
   0x6   :  { %v2033_v21 = vld [vmem:[%s3715_s0 + $0x38] sm:$0xff]  ;;  %v2038_v22 = vld [vmem:[%s3715_s0 + $0xb0] sm:$0xff]  ;;  %v104_v24 = vadd.f32 %v2023_v19, %v2018_v18  ;;  %v2074_v31 = vld [vmem:[%s3715_s0 + $0x40] sm:$0xff] }
   0x7   :  { %v2043_v23 = vld [vmem:[%s3715_s0 + $0xb8] sm:$0xff]  ;;  %v77_v25 = vadd.f32 %v2033_v21, %v2028_v20  ;;  %v2054_v27 = vld [vmem:[%s3715_s0 + $0x50] sm:$0xff]  ;;  %v2079_v32 = vld [vmem:[%s3715_s0 + $0x48] sm:$0xff]  ;;  %v1785_v51 = vpop.eup %1784 }
   0x8   :  { %v101_v26 = vadd.f32 %v2043_v23, %v2038_v22  ;;  %v2059_v28 = vld [vmem:[%s3715_s0 + $0x58] sm:$0xff]  ;;  %v2064_v29 = vld [vmem:[%s3715_s0 + $0xd0] sm:$0xff]  ;;  %v80_v35 = vadd.f32 %v2079_v32, %v2074_v31  ;;  %v2090_v36 = vld [vmem:[%s3715_s0 + $0x60] sm:$0xff]  ;;  %v117_v52 = vmul.f32 256.0, %v1785_v51  ;;  %vm121_vm0 = vweird.f32 %v1785_v51 }
   0x9   :  { %v2069_v30 = vld [vmem:[%s3715_s0 + $0xd8] sm:$0xff]  ;;  %v83_v33 = vadd.f32 %v2059_v28, %v2054_v27  ;;  %v2095_v37 = vld [vmem:[%s3715_s0 + $0x68] sm:$0xff]  ;;  %v2100_v38 = vld [vmem:[%s3715_s0 + $0xe0] sm:$0xff] }
   0xa   :  { %v107_v34 = vadd.f32 %v2069_v30, %v2064_v29  ;;  %v2105_v39 = vld [vmem:[%s3715_s0 + $0xe8] sm:$0xff]  ;;  %v2110_v40 = vld [vmem:[%s3715_s0 + $0xf0] sm:$0xff]  ;;  %v2115_v41 = vld [vmem:[%s3715_s0 + $0xf8] sm:$0xff]  ;;  %v86_v42 = vadd.f32 %v2095_v37, %v2090_v36  ;;  %v118_v53 = vsub.f32 1.0, %v117_v52 }
   0xb   :  { %v110_v43 = vadd.f32 %v2105_v39, %v2100_v38  ;;  %v113_v44 = vadd.f32 %v2115_v41, %v2110_v40  ;;  %v2126_v45 = vld [vmem:[%s3715_s0 + $0x70] sm:$0xff]  ;;  %v2131_v46 = vld [vmem:[%s3715_s0 + $0x78] sm:$0xff]  ;;  %v1779_v48 = vld [vmem:[%s3716_s8] ss:$0 sm:$0xff] }
   0xc   :  { %75 = vadd.xlane.f32.xlu2 %v74_v15  ;;  %v89_v47 = vadd.f32 %v2131_v46, %v2126_v45  ;;  %v1780_v49 = vld [vmem:[%s3717_s7] ss:$0 sm:$0xff]  ;;  %v119_v54 = vmul.f32 %v1785_v51, %v118_v53 }
   0xd   :  { %72 = vadd.xlane.f32.xlu1 %v71_v16  ;;  %69 = vadd.xlane.f32.xlu0 %v68_v17 }
   0xe   :  { %v120_v55 = vadd.f32 %v1785_v51, %v119_v54 }
  0x10   :  { %v2141_v56 = vsel %vm121_vm0, %v1785_v51, %v120_v55 }
  0x14   :  { %105 = vadd.xlane.f32.xlu2 %v104_v24 }
  0x15   :  { %78 = vadd.xlane.f32.xlu1 %v77_v25  ;;  %102 = vadd.xlane.f32.xlu0 %v101_v26 }
  0x1c   :  { %84 = vadd.xlane.f32.xlu2 %v83_v33 }
  0x1d   :  { %108 = vadd.xlane.f32.xlu1 %v107_v34  ;;  %81 = vadd.xlane.f32.xlu0 %v80_v35 }
  0x24   :  { %87 = vadd.xlane.f32.xlu2 %v86_v42 }
  0x25   :  { %111 = vadd.xlane.f32.xlu0 %v110_v43  ;;  %114 = vadd.xlane.f32.xlu1 %v113_v44 }
  0x2d   :  { %90 = vadd.xlane.f32.xlu0 %v89_v47 }
  0x3e   :  { %1636 = vrot.lane.b32.xlu1 %v1779_v48, %s1884_s21 }
  0x41   :  { %1615 = vrot.lane.b32.xlu0 %v1780_v49, %s1884_s21 }
  0x77   :  { %v100_v57 = vpop.xlane.xlu2 %99 }
  0x78   :  { %v133_v58 = vmul.f32 %v2141_v56, %v100_v57  ;;  %v97_v59 = vpop.xlane.xlu1 %96  ;;  %v94_v60 = vpop.xlane.xlu0 %93 }
  0x79   :  { %v132_v61 = vmul.f32 %v2141_v56, %v97_v59  ;;  %v131_v62 = vmul.f32 %v2141_v56, %v94_v60 }
  0x7a   :  { %v2159_v15 = vsub.f32 %v1946_v0, %v133_v58  ;;  %v2162_v16 = vsub.f32 %v1951_v1, %v133_v58 }
  0x7b   :  { %v2147_v63 = vsub.f32 %v1956_v2, %v132_v61  ;;  %v2150_v3 = vsub.f32 %v1963_v4, %v132_v61  ;;  %v2153_v7 = vsub.f32 %v1968_v5, %v131_v62  ;;  %v2156_v8 = vsub.f32 %v1973_v6, %v131_v62 }
  0x7c   :  { %v191_v1 = vmul.f32 %v2159_v15, %v2159_v15  ;;  %v192_v33 = vmul.f32 %v2162_v16, %v2162_v16 }
  0x7d   :  { %v189_v17 = vmul.f32 %v2147_v63, %v2147_v63  ;;  %v190_v2 = vmul.f32 %v2150_v3, %v2150_v3  ;;  %v187_v4 = vmul.f32 %v2153_v7, %v2153_v7  ;;  %v188_v5 = vmul.f32 %v2156_v8, %v2156_v8 }
  0x7e   :  { %v233_v49 = vadd.f32 %v192_v33, %v191_v1 }
  0x7f   :  { %v76_v6 = vpop.xlane.xlu2 %75  ;;  %v230_v24 = vadd.f32 %v190_v2, %v189_v17  ;;  %v227_v25 = vadd.f32 %v188_v5, %v187_v4 }
  0x80   :  { %v73_v0 = vpop.xlane.xlu1 %72  ;;  %v70_v26 = vpop.xlane.xlu0 %69  ;;  %v125_v42 = vmul.f32 %v2141_v56, %v76_v6 }
  0x81   :  { %v124_v34 = vmul.f32 %v2141_v56, %v73_v0  ;;  %v123_v35 = vmul.f32 %v2141_v56, %v70_v26  ;;  %231 = vadd.xlane.f32.xlu2 %v230_v24  ;;  %228 = vadd.xlane.f32.xlu1 %v227_v25 }
  0x82   :  { %v2200_v52 = vsub.f32 %v1982_v9, %v125_v42 }
  0x83   :  { %v2180_v43 = vsub.f32 %v1992_v11, %v124_v34  ;;  %v2183_v44 = vsub.f32 %v1997_v12, %v124_v34  ;;  %v2186_v47 = vsub.f32 %v2002_v13, %v123_v35  ;;  %v2189_v48 = vsub.f32 %v2007_v14, %v123_v35 }
  0x84   :  { %v2203_v13 = vsub.f32 %v1987_v10, %v125_v42  ;;  %v175_v9 = vmul.f32 %v2200_v52, %v2200_v52 }
  0x85   :  { %v173_v50 = vmul.f32 %v2180_v43, %v2180_v43  ;;  %v174_v51 = vmul.f32 %v2183_v44, %v2183_v44  ;;  %v171_v11 = vmul.f32 %v2186_v47, %v2186_v47  ;;  %v172_v12 = vmul.f32 %v2189_v48, %v2189_v48 }
  0x86   :  { %v176_v10 = vmul.f32 %v2203_v13, %v2203_v13 }
  0x87   :  { %v106_v14 = vpop.xlane.xlu2 %105  ;;  %v206_v53 = vadd.f32 %v174_v51, %v173_v50  ;;  %v203_v54 = vadd.f32 %v172_v12, %v171_v11  ;;  %v564_v11 = vld [vmem:[%s3718_s3 + $0x78] sm:$0xff] }
  0x88   :  { %v79_v55 = vpop.xlane.xlu1 %78  ;;  %v103_v57 = vpop.xlane.xlu0 %102  ;;  %v135_v60 = vmul.f32 %v2141_v56, %v106_v14  ;;  %v580_v12 = vld [vmem:[%s3718_s3 + $0xf8] sm:$0xff]  ;;  %1743 = vmatpush.msra.mxu2 %v564_v11  ;;  %585 = vmatpush.msra.mxu0 %v564_v11 }
  0x89   :  { %v126_v58 = vmul.f32 %v2141_v56, %v79_v55  ;;  %v134_v59 = vmul.f32 %v2141_v56, %v103_v57  ;;  %234 = vadd.xlane.f32.xlu2 %v233_v49  ;;  %207 = vadd.xlane.f32.xlu1 %v206_v53 }
  0x8a   :  { %204 = vadd.xlane.f32.xlu0 %v203_v54  ;;  %1759 = vmatpush.msra.mxu3 %v580_v12 }
  0x8b   :  { %v2213_v61 = vsub.f32 %v2028_v20, %v126_v58  ;;  %v2216_v62 = vsub.f32 %v2033_v21, %v126_v58  ;;  %v2219_v17 = vsub.f32 %v2038_v22, %v134_v59  ;;  %v2222_v2 = vsub.f32 %v2043_v23, %v134_v59  ;;  %650 = vmatpush.msra.mxu1 %v580_v12 }
  0x8c   :  { %v2233_v21 = vsub.f32 %v2018_v18, %v135_v60  ;;  %v2236_v22 = vsub.f32 %v2023_v19, %v135_v60  ;;  %v209_v23 = vadd.f32 %v176_v10, %v175_v9 }
  0x8d   :  { %v177_v4 = vmul.f32 %v2213_v61, %v2213_v61  ;;  %v178_v5 = vmul.f32 %v2216_v62, %v2216_v62  ;;  %v193_v6 = vmul.f32 %v2219_v17, %v2219_v17  ;;  %v194_v20 = vmul.f32 %v2222_v2, %v2222_v2 }
  0x8e   :  { %v195_v18 = vmul.f32 %v2233_v21, %v2233_v21  ;;  %v196_v19 = vmul.f32 %v2236_v22, %v2236_v22 }
  0x8f   :  { %v85_v24 = vpop.xlane.xlu2 %84  ;;  %v212_v25 = vadd.f32 %v178_v5, %v177_v4  ;;  %v236_v0 = vadd.f32 %v194_v20, %v193_v6 }
  0x90   :  { %v128_v26 = vmul.f32 %v2141_v56, %v85_v24  ;;  %v109_v1 = vpop.xlane.xlu1 %108  ;;  %v82_v33 = vpop.xlane.xlu0 %81 }
  0x91   :  { %v136_v34 = vmul.f32 %v2141_v56, %v109_v1  ;;  %v127_v35 = vmul.f32 %v2141_v56, %v82_v33  ;;  %213 = vadd.xlane.f32.xlu2 %v212_v25  ;;  %237 = vadd.xlane.f32.xlu1 %v236_v0 }
  0x92   :  { %210 = vadd.xlane.f32.xlu0 %v209_v23 }
  0x93   :  { %v2246_v42 = vsub.f32 %v2064_v29, %v136_v34  ;;  %v2249_v49 = vsub.f32 %v2069_v30, %v136_v34  ;;  %v2252_v50 = vsub.f32 %v2074_v31, %v127_v35  ;;  %v2255_v51 = vsub.f32 %v2079_v32, %v127_v35  ;;  %v563_v29 = vld [vmem:[%s3718_s3 + $0x70] sm:$0xff] }
  0x94   :  { %v2267_v30 = vsub.f32 %v2054_v27, %v128_v26  ;;  %v2270_v31 = vsub.f32 %v2059_v28, %v128_v26  ;;  %v579_v32 = vld [vmem:[%s3718_s3 + $0xf0] sm:$0xff]  ;;  %v239_v28 = vadd.f32 %v196_v19, %v195_v18  ;;  %1744 = vmatpush.msra.mxu2 %v563_v29  ;;  %586 = vmatpush.msra.mxu0 %v563_v29 }
  0x95   :  { %3741 = vst [vmem:[#allocation2_spill] sm:$0xff] %v2246_v42  ;;  %v197_v14 = vmul.f32 %v2246_v42, %v2246_v42  ;;  %v198_v53 = vmul.f32 %v2249_v49, %v2249_v49  ;;  %v179_v54 = vmul.f32 %v2252_v50, %v2252_v50  ;;  %v180_v27 = vmul.f32 %v2255_v51, %v2255_v51 }
  0x96   :  { %3742 = vst [vmem:[#allocation3_spill] sm:$0xff] %v2249_v49  ;;  %1760 = vmatpush.msra.mxu3 %v579_v32  ;;  %v181_v4 = vmul.f32 %v2267_v30, %v2267_v30  ;;  %v182_v5 = vmul.f32 %v2270_v31, %v2270_v31  ;;  %651 = vmatpush.msra.mxu1 %v579_v32 }
  0x97   :  { %3743 = vst [vmem:[#allocation4_spill] sm:$0xff] %v2255_v51  ;;  %v88_v55 = vpop.xlane.xlu2 %87  ;;  %v242_v57 = vadd.f32 %v198_v53, %v197_v14  ;;  %v215_v58 = vadd.f32 %v180_v27, %v179_v54  ;;  %v562_v53 = vld [vmem:[%s3718_s3 + $0x68] sm:$0xff]  ;;  %v577_v54 = vld [vmem:[%s3718_s3 + $0xe0] sm:$0xff]  ;;  %v560_v27 = vld [vmem:[%s3718_s3 + $0x58] sm:$0xff] }
  0x98   :  { %3744 = vst [vmem:[#allocation5_spill] sm:$0xff] %v2267_v30  ;;  %v129_v59 = vmul.f32 %v2141_v56, %v88_v55  ;;  %v112_v60 = vpop.xlane.xlu0 %111  ;;  %v115_v9 = vpop.xlane.xlu1 %114  ;;  %v218_v33 = vadd.f32 %v182_v5, %v181_v4  ;;  %1745 = vmatpush.msra.mxu2 %v562_v53  ;;  %587 = vmatpush.msra.mxu0 %v562_v53  ;;  %v559_v55 = vld [vmem:[%s3718_s3 + $0x50] sm:$0xff]  ;;  %v572_v4 = vld [vmem:[%s3718_s3 + $0xb8] sm:$0xff] }
  0x99   :  { %3745 = vst [vmem:[#allocation6_spill] sm:$0xff] %v2270_v31  ;;  %v137_v10 = vmul.f32 %v2141_v56, %v112_v60  ;;  %243 = vadd.xlane.f32.xlu2 %v242_v57  ;;  %216 = vadd.xlane.f32.xlu1 %v215_v58  ;;  %v138_v23 = vmul.f32 %v2141_v56, %v115_v9  ;;  %v575_v57 = vld [vmem:[%s3718_s3 + $0xd0] sm:$0xff]  ;;  %v558_v58 = vld [vmem:[%s3718_s3 + $0x48] sm:$0xff]  ;;  %v557_v60 = vld [vmem:[%s3718_s3 + $0x40] sm:$0xff] }
  0x9a   :  { %v2290_v6 = vsub.f32 %v2090_v36, %v129_v59  ;;  %v2293_v20 = vsub.f32 %v2095_v37, %v129_v59  ;;  %240 = vadd.xlane.f32.xlu0 %v239_v28  ;;  %v576_v28 = vld [vmem:[%s3718_s3 + $0xd8] sm:$0xff]  ;;  %v574_v59 = vld [vmem:[%s3718_s3 + $0xc8] sm:$0xff]  ;;  %v573_v9 = vld [vmem:[%s3718_s3 + $0xc0] sm:$0xff] }
  0x9b   :  { %v2297_v24 = vsub.f32 %v2100_v38, %v137_v10  ;;  %v2300_v25 = vsub.f32 %v2105_v39, %v137_v10  ;;  %v2311_v1 = vsub.f32 %v2110_v40, %v138_v23  ;;  %v2314_v38 = vsub.f32 %v2115_v41, %v138_v23  ;;  %v556_v10 = vld [vmem:[%s3718_s3 + $0x38] sm:$0xff]  ;;  %v555_v5 = vld [vmem:[%s3718_s3 + $0x30] sm:$0xff] }
  0x9c   :  { %3746 = vst [vmem:[#allocation7_spill] sm:$0xff] %v2290_v6  ;;  %v183_v0 = vmul.f32 %v2290_v6, %v2290_v6  ;;  %v184_v36 = vmul.f32 %v2293_v20, %v2293_v20  ;;  %v571_v23 = vld [vmem:[%s3718_s3 + $0xb0] sm:$0xff] }
  0x9d   :  { %3747 = vst [vmem:[#allocation8_spill] sm:$0xff] %v2293_v20  ;;  %v199_v37 = vmul.f32 %v2297_v24, %v2297_v24  ;;  %v200_v26 = vmul.f32 %v2300_v25, %v2300_v25  ;;  %v201_v19 = vmul.f32 %v2311_v1, %v2311_v1  ;;  %v202_v11 = vmul.f32 %v2314_v38, %v2314_v38 }
  0x9e   :  { %3748 = vst [vmem:[#allocation9_spill] sm:$0xff] %v2297_v24  ;;  %v221_v39 = vadd.f32 %v184_v36, %v183_v0  ;;  %v554_v0 = vld [vmem:[%s3718_s3 + $0x28] sm:$0xff] }
  0x9f   :  { %3749 = vst [vmem:[#allocation10_spill] sm:$0xff] %v2300_v25  ;;  %v245_v34 = vadd.f32 %v200_v26, %v199_v37  ;;  %v248_v32 = vadd.f32 %v202_v11, %v201_v19  ;;  %v570_v36 = vld [vmem:[%s3718_s3 + $0xa8] sm:$0xff]  ;;  %v553_v37 = vld [vmem:[%s3718_s3 + $0x20] sm:$0xff] }
  0xa0   :  { %3750 = vst [vmem:[#allocation11_spill] sm:$0xff] %v2311_v1  ;;  %v91_v35 = vpop.xlane.xlu0 %90  ;;  %v569_v26 = vld [vmem:[%s3718_s3 + $0xa0] sm:$0xff]  ;;  %v550_v19 = vld [vmem:[%s3718_s3 + $0x8] sm:$0xff] }
  0xa1   :  { %3751 = vst [vmem:[#allocation12_spill] sm:$0xff] %v2314_v38  ;;  %v130_v18 = vmul.f32 %v2141_v56, %v91_v35  ;;  %222 = vadd.xlane.f32.xlu2 %v221_v39  ;;  %246 = vadd.xlane.f32.xlu1 %v245_v34  ;;  %v568_v34 = vld [vmem:[%s3718_s3 + $0x98] sm:$0xff]  ;;  %v551_v35 = vld [vmem:[%s3718_s3 + $0x10] sm:$0xff]  ;;  %v566_v11 = vld [vmem:[%s3718_s3 + $0x88] sm:$0xff] }
  0xa2   :  { %219 = vadd.xlane.f32.xlu0 %v218_v33  ;;  %v552_v33 = vld [vmem:[%s3718_s3 + $0x18] sm:$0xff] }
  0xa3   :  { %v2322_v40 = vsub.f32 %v2126_v45, %v130_v18  ;;  %v2325_v41 = vsub.f32 %v2131_v46, %v130_v18  ;;  %v578_v45 = vld [vmem:[%s3718_s3 + $0xe8] sm:$0xff]  ;;  %v561_v46 = vld [vmem:[%s3718_s3 + $0x60] sm:$0xff]  ;;  %v567_v18 = vld [vmem:[%s3718_s3 + $0x90] sm:$0xff] }
  0xa4   :  { %1761 = vmatpush.msra.mxu3 %v578_v45  ;;  %652 = vmatpush.msra.mxu1 %v578_v45 }
  0xa5   :  { %3752 = vst [vmem:[#allocation13_spill] sm:$0xff] %v2322_v40  ;;  %v185_v12 = vmul.f32 %v2322_v40, %v2322_v40  ;;  %v186_v29 = vmul.f32 %v2325_v41, %v2325_v41  ;;  %1746 = vmatpush.msra.mxu2 %v561_v46  ;;  %588 = vmatpush.msra.mxu0 %v561_v46 }
  0xa6   :  { %3753 = vst [vmem:[#allocation14_spill] sm:$0xff] %v2325_v41  ;;  %1762 = vmatpush.msra.mxu3 %v577_v54  ;;  %653 = vmatpush.msra.mxu1 %v577_v54 }
  0xa7   :  { %v224_v14 = vadd.f32 %v186_v29, %v185_v12  ;;  %1747 = vmatpush.msra.mxu2 %v560_v27  ;;  %589 = vmatpush.msra.mxu0 %v560_v27  ;;  %v549_v12 = vld [vmem:[%s3718_s3] sm:$0xff] }
  0xa8   :  { %1763 = vmatpush.msra.mxu3 %v576_v28  ;;  %654 = vmatpush.msra.mxu1 %v576_v28  ;;  %v565_v29 = vld [vmem:[%s3718_s3 + $0x80] sm:$0xff] }
  0xa9   :  { %225 = vadd.xlane.f32.xlu1 %v224_v14  ;;  %1748 = vmatpush.msra.mxu2 %v559_v55 }
  0xaa   :  { %249 = vadd.xlane.f32.xlu0 %v248_v32  ;;  %1764 = vmatpush.msra.mxu3 %v575_v57 }
  0xab   :  { %590 = vmatpush.msra.mxu0 %v559_v55  ;;  %655 = vmatpush.msra.mxu1 %v575_v57 }
  0xac   :  { %1749 = vmatpush.msra.mxu2 %v558_v58  ;;  %1765 = vmatpush.msra.mxu3 %v574_v59 }
  0xad   :  { %591 = vmatpush.msra.mxu0 %v558_v58  ;;  %656 = vmatpush.msra.mxu1 %v574_v59 }
  0xae   :  { %1750 = vmatpush.msra.mxu2 %v557_v60  ;;  %1766 = vmatpush.msra.mxu3 %v573_v9 }
  0xaf   :  { %592 = vmatpush.msra.mxu0 %v557_v60  ;;  %657 = vmatpush.msra.mxu1 %v573_v9 }
  0xb0   :  { %1751 = vmatpush.msra.mxu2 %v556_v10  ;;  %1767 = vmatpush.msra.mxu3 %v572_v4  ;;  %v2391_v39 = vpop.permute.xlu1 %1636 }
  0xb1   :  { %593 = vmatpush.msra.mxu0 %v556_v10  ;;  %658 = vmatpush.msra.mxu1 %v572_v4  ;;  %3754 = vst [vmem:[#allocation15_spill] sm:$0xff] %v2391_v39 }
  0xb2   :  { %1752 = vmatpush.msra.mxu2 %v555_v5  ;;  %1768 = vmatpush.msra.mxu3 %v571_v23 }
  0xb3   :  { %594 = vmatpush.msra.mxu0 %v555_v5  ;;  %659 = vmatpush.msra.mxu1 %v571_v23  ;;  %v2417_v53 = vpop.permute.xlu0 %1615 }
  0xb4   :  { %1753 = vmatpush.msra.mxu2 %v554_v0  ;;  %1769 = vmatpush.msra.mxu3 %v570_v36  ;;  %3755 = vst [vmem:[#allocation16_spill] sm:$0xff] %v2417_v53 }
  0xb5   :  { %595 = vmatpush.msra.mxu0 %v554_v0  ;;  %660 = vmatpush.msra.mxu1 %v570_v36 }
  0xb6   :  { %1754 = vmatpush.msra.mxu2 %v553_v37  ;;  %1770 = vmatpush.msra.mxu3 %v569_v26 }
  0xb7   :  { %596 = vmatpush.msra.mxu0 %v553_v37  ;;  %661 = vmatpush.msra.mxu1 %v569_v26 }
  0xb8   :  { %1755 = vmatpush.msra.mxu2 %v552_v33  ;;  %1771 = vmatpush.msra.mxu3 %v568_v34 }
  0xb9   :  { %597 = vmatpush.msra.mxu0 %v552_v33  ;;  %662 = vmatpush.msra.mxu1 %v568_v34 }
  0xba   :  { %1756 = vmatpush.msra.mxu2 %v551_v35  ;;  %1772 = vmatpush.msra.mxu3 %v567_v18 }
  0xbb   :  { %598 = vmatpush.msra.mxu0 %v551_v35  ;;  %663 = vmatpush.msra.mxu1 %v567_v18 }
  0xbc   :  { %1757 = vmatpush.msra.mxu2 %v550_v19  ;;  %1773 = vmatpush.msra.mxu3 %v566_v11 }
  0xbd   :  { %599 = vmatpush.msra.mxu0 %v550_v19  ;;  %664 = vmatpush.msra.mxu1 %v566_v11 }
  0xbe   :  { %1758 = vmatpush.msra.mxu2 %v549_v12  ;;  %1774 = vmatpush.msra.mxu3 %v565_v29 }
  0xbf   :  { %600 = vmatpush.msra.mxu0 %v549_v12  ;;  %665 = vmatpush.msra.mxu1 %v565_v29 }
  0xf4   :  { %v232_v32 = vpop.xlane.xlu2 %231  ;;  %v229_v14 = vpop.xlane.xlu1 %228 }
  0xf5   :  { %v259_v45 = vmul.f32 %v229_v14, %v2141_v56  ;;  %v260_v46 = vmul.f32 %v232_v32, %v2141_v56 }
  0xf7   :  { %v275_v54 = vadd.f32 1e-05, %v259_v45  ;;  %v2421_v27 = vadd.f32 1e-05, %v260_v46  ;;  %v66_v45 = vld [vmem:[%s3720_s1] sm:$0x3] }
  0xf9   :  { %1786 = vrsqrt.f32 %v275_v54  ;;  %vm369_vm2 = vweird.f32 %v275_v54  ;;  %vm379_vm4 = vweird.f32 %v2421_v27 }
  0xfa   :  { %1788 = vrsqrt.f32 %v2421_v27 }
  0xfc   :  { %v235_v28 = vpop.xlane.xlu2 %234  ;;  %v208_v55 = vpop.xlane.xlu1 %207 }
  0xfd   :  { %v261_v57 = vmul.f32 %v235_v28, %v2141_v56  ;;  %v205_v58 = vpop.xlane.xlu0 %204  ;;  %v252_v10 = vmul.f32 %v208_v55, %v2141_v56 }
  0xfe   :  { %v251_v59 = vmul.f32 %v205_v58, %v2141_v56  ;;  %v2460_v58 = vperm.slane %v66_v45, 0 }
  0xff   :  { %v2426_v60 = vadd.f32 1e-05, %v261_v57  ;;  %v1787_v9 = vpop.eup %1786  ;;  %v2433_v0 = vadd.f32 1e-05, %v252_v10 }
 0x100   :  { %v2429_v4 = vadd.f32 1e-05, %v251_v59  ;;  %v364_v5 = vmul.f32 %v1787_v9, %v275_v54  ;;  %v2435_v26 = vpop.eup %1788  ;;  %vm370_vm1 = vweird.f32 %v1787_v9 }
 0x101   :  { %1790 = vrsqrt.f32 %v2426_v60  ;;  %v374_v14 = vmul.f32 %v2435_v26, %v2421_v27  ;;  %vm371_vm3 = vmor %vm369_vm2, %vm370_vm1  ;;  %vm380_vm6 = vweird.f32 %v2435_v26  ;;  %vm299_vm8 = vweird.f32 %v2433_v0 }
 0x102   :  { %v365_v23 = vmul.f32 %v1787_v9, %v364_v5  ;;  %1792 = vrsqrt.f32 %v2429_v4  ;;  %vm289_vm7 = vweird.f32 %v2429_v4  ;;  %vm2534_vm10 = vmor %vm379_vm4, %vm380_vm6  ;;  %vm389_vm11 = vweird.f32 %v2426_v60 }
 0x103   :  { %1794 = vrsqrt.f32 %v2433_v0  ;;  %v375_v59 = vmul.f32 %v2435_v26, %v374_v14 }
 0x104   :  { %v214_v36 = vpop.xlane.xlu2 %213  ;;  %v238_v37 = vpop.xlane.xlu1 %237  ;;  %v366_v33 = vmul.f32 0.5, %v365_v23 }
 0x105   :  { %v254_v34 = vmul.f32 %v214_v36, %v2141_v56  ;;  %v262_v35 = vmul.f32 %v238_v37, %v2141_v56  ;;  %v211_v18 = vpop.xlane.xlu0 %210 }
 0x106   :  { %v253_v19 = vmul.f32 %v211_v18, %v2141_v56  ;;  %v367_v11 = vsub.f32 1.5, %v366_v33 }
 0x107   :  { %v2440_v12 = vadd.f32 1e-05, %v254_v34  ;;  %v2442_v29 = vadd.f32 1e-05, %v262_v35  ;;  %v2444_v32 = vpop.eup %1790  ;;  %v67_v35 = vld [vmem:[%s3721_s2] sm:$0x3] }
 0x108   :  { %v2452_v46 = vpop.eup %1792  ;;  %v368_v28 = vmul.f32 %v1787_v9, %v367_v11  ;;  %v2455_v55 = vadd.f32 1e-05, %v253_v19  ;;  %v384_v10 = vmul.f32 %v2444_v32, %v2426_v60  ;;  %v2485_v53 = vperm.slane %v67_v35, 0 }
 0x109   :  { %1796 = vrsqrt.f32 %v2440_v12  ;;  %v284_v57 = vmul.f32 %v2452_v46, %v2429_v4  ;;  %v2473_v19 = vpop.eup %1794  ;;  %vm290_vm5 = vweird.f32 %v2452_v46  ;;  %vm390_vm12 = vweird.f32 %v2444_v32 }
 0x10a   :  { %1798 = vrsqrt.f32 %v2442_v29  ;;  %v372_v37 = vsel %vm371_vm3, %v1787_v9, %v368_v28  ;;  %vm291_vm9 = vmor %vm289_vm7, %vm290_vm5  ;;  %vm300_vm13 = vweird.f32 %v2473_v19  ;;  %vm399_vm14 = vweird.f32 %v2442_v29 }
 0x10b   :  { %v285_v5 = vmul.f32 %v2452_v46, %v284_v57  ;;  %1800 = vrsqrt.f32 %v2455_v55  ;;  %v459_v18 = vmul.f32 %v372_v37, %v2153_v7  ;;  %v460_v7 = vmul.f32 %v372_v37, %v2156_v8  ;;  %vm2588_vm3 = vmor %vm299_vm8, %vm300_vm13 }
 0x10c   :  { %v244_v23 = vpop.xlane.xlu2 %243  ;;  %v217_v36 = vpop.xlane.xlu1 %216  ;;  %vm309_vm15 = vweird.f32 %v2455_v55  ;;  %vm319_vm0 = vweird.f32 %v2440_v12  ;;  %vm2608_vm6 = vmor %vm389_vm11, %vm390_vm12 }
 0x10d   :  { %v264_v54 = vmul.f32 %v244_v23, %v2141_v56  ;;  %v255_v33 = vmul.f32 %v217_v36, %v2141_v56  ;;  %v241_v34 = vpop.xlane.xlu0 %240  ;;  %v286_v11 = vmul.f32 0.5, %v285_v5  ;;  %v2482_v23 = vperm.slane %v66_v45, 1 }
 0x10e   :  { %v263_v28 = vmul.f32 %v241_v34, %v2141_v56  ;;  %v376_v36 = vmul.f32 0.5, %v375_v59  ;;  %v496_v39 = vmul.f32 %v2460_v58, %v459_v18  ;;  %v385_v5 = vmul.f32 %v2444_v32, %v384_v10 }
 0x10f   :  { %v2475_v14 = vpop.eup %1796  ;;  %v2477_v57 = vadd.f32 1e-05, %v264_v54  ;;  %v2479_v9 = vadd.f32 1e-05, %v255_v33  ;;  %v294_v54 = vmul.f32 %v2473_v19, %v2433_v0  ;;  %v287_v33 = vsub.f32 1.5, %v286_v11 }
 0x110   :  { %v2488_v25 = vpop.eup %1798  ;;  %v314_v34 = vmul.f32 %v2475_v14, %v2440_v12  ;;  %v2496_v45 = vperm.slane %v67_v35, 1  ;;  %v2504_v10 = vadd.f32 1e-05, %v263_v28  ;;  %v377_v37 = vsub.f32 1.5, %v376_v36 }
 0x111   :  { %1802 = vrsqrt.f32 %v2477_v57  ;;  %v2498_v59 = vpop.eup %1800  ;;  %v394_v8 = vmul.f32 %v2488_v25, %v2442_v29  ;;  %v533_v18 = vadd.f32 %v2485_v53, %v496_v39  ;;  %v497_v11 = vmul.f32 %v2482_v23, %v460_v7 }
 0x112   :  { %1804 = vrsqrt.f32 %v2479_v9  ;;  %v386_v24 = vmul.f32 0.5, %v385_v5  ;;  %v295_v30 = vmul.f32 %v2473_v19, %v294_v54  ;;  %v288_v28 = vmul.f32 %v2452_v46, %v287_v33 }
 0x113   :  { %1806 = vrsqrt.f32 %v2504_v10  ;;  %v315_v36 = vmul.f32 %v2475_v14, %v314_v34  ;;  %v304_v38 = vmul.f32 %v2498_v59, %v2455_v55  ;;  %625 = vmatmul.f32.vlgmr.msra.gmra.mxu2 %v533_v18  ;;  %v534_v39 = vadd.f32 %v2496_v45, %v497_v11 }
 0x114   :  { %v223_v35 = vpop.xlane.xlu2 %222  ;;  %v247_v31 = vpop.xlane.xlu1 %246  ;;  %v395_v7 = vmul.f32 %v2488_v25, %v394_v8  ;;  %v378_v18 = vmul.f32 %v2435_v26, %v377_v37  ;;  %v387_v11 = vsub.f32 1.5, %v386_v24  ;;  %v296_v20 = vmul.f32 0.5, %v295_v30 }
 0x115   :  { %v257_v41 = vmul.f32 %v223_v35, %v2141_v56  ;;  %v220_v40 = vpop.xlane.xlu0 %219  ;;  %v265_v54 = vmul.f32 %v247_v31, %v2141_v56  ;;  %690 = vmatmul.f32.vlgmr.msra.gmra.mxu3 %v534_v39  ;;  %v292_v30 = vsel %vm291_vm9, %v2452_v46, %v288_v28  ;;  %vm320_vm1 = vweird.f32 %v2475_v14 }
 0x116   :  { %v256_v33 = vmul.f32 %v220_v40, %v2141_v56  ;;  %v316_v40 = vmul.f32 0.5, %v315_v36  ;;  %v396_v4 = vmul.f32 0.5, %v395_v7  ;;  %v2558_v28 = vmul.f32 %v2444_v32, %v387_v11 }
 0x117   :  { %v2519_v5 = vadd.f32 1e-05, %v257_v41  ;;  %v2522_v35 = vpop.eup %1802  ;;  %v305_v41 = vmul.f32 %v2498_v59, %v304_v38  ;;  %v2546_v27 = vadd.f32 1e-05, %v265_v54  ;;  %v297_v36 = vsub.f32 1.5, %v296_v20 }
 0x118   :  { %v2526_v34 = vpop.eup %1804  ;;  %v414_v8 = vmul.f32 %v2522_v35, %v2477_v57  ;;  %v2555_v46 = vadd.f32 1e-05, %v256_v33  ;;  %v443_v39 = vmul.f32 %v292_v30, %v2186_v47  ;;  %v382_v7 = vsel %vm2534_vm10, %v2435_v26, %v378_v18 }
 0x119   :  { %v2542_v24 = vpop.eup %1806  ;;  %1808 = vrsqrt.f32 %v2519_v5  ;;  %v324_v37 = vmul.f32 %v2526_v34, %v2479_v9  ;;  %v317_v54 = vsub.f32 1.5, %v316_v40  ;;  %v306_v1 = vmul.f32 0.5, %v305_v41 }
 0x11a   :  { %v404_v38 = vmul.f32 %v2542_v24, %v2504_v10  ;;  %v461_v51 = vmul.f32 %v382_v7, %v2147_v63  ;;  %1810 = vrsqrt.f32 %v2546_v27  ;;  %v480_v11 = vmul.f32 %v2460_v58, %v443_v39 }
 0x11b   :  { %v444_v20 = vmul.f32 %v292_v30, %v2189_v48  ;;  %v462_v6 = vmul.f32 %v382_v7, %v2150_v3  ;;  %v397_v47 = vsub.f32 1.5, %v396_v4  ;;  %v415_v42 = vmul.f32 %v2522_v35, %v414_v8 }
 0x11c   :  { %v405_v49 = vmul.f32 %v2542_v24, %v404_v38  ;;  %v226_v33 = vpop.xlane.xlu1 %225  ;;  %v325_v26 = vmul.f32 %v2526_v34, %v324_v37  ;;  %1812 = vrsqrt.f32 %v2555_v46  ;;  %v517_v63 = vadd.f32 %v2485_v53, %v480_v11 }
 0x11d   :  { %v498_v31 = vmul.f32 %v2460_v58, %v461_v51  ;;  %v481_v40 = vmul.f32 %v2482_v23, %v444_v20  ;;  %v258_v41 = vmul.f32 %v226_v33, %v2141_v56  ;;  %v298_v48 = vmul.f32 %v2473_v19, %v297_v36  ;;  %v250_v4 = vpop.xlane.xlu0 %249 }
 0x11e   :  { %vm400_vm2 = vweird.f32 %v2488_v25  ;;  %v307_v3 = vsub.f32 1.5, %v306_v1  ;;  %v406_v30 = vmul.f32 0.5, %v405_v49  ;;  %vm310_vm4 = vweird.f32 %v2498_v59  ;;  %601 = vmatmul.f32.vlgmr.msra.gmra.mxu0 %v517_v63 }
 0x11f   :  { %v2574_v18 = vpop.eup %1808  ;;  %v535_v8 = vadd.f32 %v2485_v53, %v498_v31  ;;  %v518_v37 = vadd.f32 %v2496_v45, %v481_v40  ;;  %v499_v38 = vmul.f32 %v2482_v23, %v462_v6  ;;  %v2597_v49 = vmul.f32 %v2475_v14, %v317_v54  ;;  %vm2629_vm9 = vmor %vm399_vm14, %vm400_vm2 }
 0x120   :  { %v416_v1 = vmul.f32 0.5, %v415_v42  ;;  %v326_v36 = vmul.f32 0.5, %v325_v26  ;;  %vm409_vm5 = vweird.f32 %v2504_v10  ;;  %v344_v0 = vmul.f32 %v2574_v18, %v2519_v5  ;;  %v2602_v39 = vpop.eup %1810  ;;  %vm2642_vm11 = vmor %vm309_vm15, %vm310_vm4 }
 0x121   :  { %v398_v6 = vmul.f32 %v2488_v25, %v397_v47  ;;  %vm329_vm7 = vweird.f32 %v2479_v9  ;;  %628 = vmatmul.f32.gmra.mxu2 %v535_v8  ;;  %666 = vmatmul.f32.vlgmr.msra.gmra.mxu1 %v518_v37  ;;  %v536_v42 = vadd.f32 %v2496_v45, %v499_v38  ;;  %v2615_v54 = vadd.f32 1e-05, %v258_v41  ;;  %vm2680_vm14 = vmor %vm319_vm0, %vm320_vm1 }
 0x122   :  { %v266_v33 = vmul.f32 %v250_v4, %v2141_v56  ;;  %v2618_v11 = vpop.eup %1812  ;;  %v308_v60 = vmul.f32 %v2498_v59, %v307_v3  ;;  %vm330_vm8 = vweird.f32 %v2526_v34  ;;  %v407_v20 = vsub.f32 1.5, %v406_v30 }
 0x123   :  { %v302_v47 = vsel %vm2588_vm3, %v2473_v19, %v298_v48  ;;  %vm410_vm10 = vweird.f32 %v2542_v24  ;;  %693 = vmatmul.f32.gmra.mxu3 %v536_v42  ;;  %1814 = vrsqrt.f32 %v2615_v54  ;;  %v417_v29 = vsub.f32 1.5, %v416_v1  ;;  %vm2712_vm1 = vmor %vm329_vm7, %vm330_vm8 }
 0x124   :  { %v2635_v56 = vadd.f32 1e-05, %v266_v33  ;;  %v445_v63 = vmul.f32 %v302_v47, %v2180_v43  ;;  %v327_v31 = vsub.f32 1.5, %v326_v36  ;;  %v345_v40 = vmul.f32 %v2574_v18, %v344_v0  ;;  %vm2702_vm0 = vmor %vm409_vm5, %vm410_vm10 }
 0x125   :  { %v392_v41 = vsel %vm2608_vm6, %v2444_v32, %v2558_v28  ;;  %vm419_vm12 = vweird.f32 %v2477_v57  ;;  %vm420_vm13 = vweird.f32 %v2522_v35  ;;  %v424_v43 = vmul.f32 %v2602_v39, %v2546_v27 }
 0x126   :  { %1816 = vrsqrt.f32 %v2635_v56  ;;  %v482_v55 = vmul.f32 %v2460_v58, %v445_v63  ;;  %v463_v48 = vmul.f32 %v392_v41, %v2159_v15  ;;  %v408_v3 = vmul.f32 %v2542_v24, %v407_v20  ;;  %vm2743_vm6 = vmor %vm419_vm12, %vm420_vm13 }
 0x127   :  { %v334_v30 = vmul.f32 %v2618_v11, %v2555_v46  ;;  %v446_v32 = vmul.f32 %v302_v47, %v2183_v44  ;;  %v464_v28 = vmul.f32 %v392_v41, %v2162_v16  ;;  %v312_v8 = vsel %vm2642_vm11, %v2498_v59, %v308_v60 }
 0x128   :  { %v519_v4 = vadd.f32 %v2485_v53, %v482_v55  ;;  %v500_v51 = vmul.f32 %v2460_v58, %v463_v48  ;;  %v402_v15 = vsel %vm2629_vm9, %v2488_v25, %v398_v6  ;;  %v346_v37 = vmul.f32 0.5, %v345_v40 }
 0x129   :  { %v483_v38 = vmul.f32 %v2482_v23, %v446_v32  ;;  %v501_v1 = vmul.f32 %v2482_v23, %v464_v28  ;;  %v447_v44 = vmul.f32 %v312_v8, %v2200_v52  ;;  %v2674_v16 = vpop.eup %1814  ;;  %vm349_vm15 = vweird.f32 %v2519_v5 }
 0x12a   :  { %v425_v25 = vmul.f32 %v2602_v39, %v424_v43  ;;  %604 = vmatmul.f32.gmra.mxu0 %v519_v4  ;;  %v537_v59 = vadd.f32 %v2485_v53, %v500_v51  ;;  %v465_v0 = vmul.f32 %v402_v15, %v2219_v17  ;;  %v448_v52 = vmul.f32 %v312_v8, %v2203_v13  ;;  %v3783_v13 = vld [vmem:[#allocation7_spill] sm:$0xff] }
 0x12b   :  { %v354_v7 = vmul.f32 %v2674_v16, %v2615_v54  ;;  %v520_v12 = vadd.f32 %v2496_v45, %v483_v38  ;;  %v538_v6 = vadd.f32 %v2496_v45, %v501_v1  ;;  %v466_v42 = vmul.f32 %v402_v15, %v2222_v2  ;;  %v3784_v2 = vld [vmem:[#allocation4_spill] sm:$0xff] }
 0x12c   :  { %v2694_v33 = vpop.eup %1816  ;;  %v418_v60 = vmul.f32 %v2522_v35, %v417_v29  ;;  %v328_v20 = vmul.f32 %v2526_v34, %v327_v31  ;;  %v335_v17 = vmul.f32 %v2618_v11, %v334_v30  ;;  %631 = vmatmul.f32.gmra.mxu2 %v537_v59  ;;  %v484_v47 = vmul.f32 %v2460_v58, %v447_v44  ;;  %v3778_v59 = vld [vmem:[#allocation2_spill] sm:$0xff] }
 0x12d   :  { %vm350_vm2 = vweird.f32 %v2574_v18  ;;  %vm429_vm3 = vweird.f32 %v2546_v27  ;;  %v355_v10 = vmul.f32 %v2674_v16, %v354_v7  ;;  %v434_v26 = vmul.f32 %v2694_v33, %v2635_v56  ;;  %669 = vmatmul.f32.gmra.mxu1 %v520_v12  ;;  %696 = vmatmul.f32.gmra.mxu3 %v538_v6 }
 0x12e   :  { %v322_v9 = vsel %vm2680_vm14, %v2475_v14, %v2597_v49  ;;  %v347_v63 = vsub.f32 1.5, %v346_v37  ;;  %v426_v19 = vmul.f32 0.5, %v425_v25  ;;  %vm430_vm4 = vweird.f32 %v2602_v39  ;;  %vm2765_vm9 = vmor %vm349_vm15, %vm350_vm2 }
 0x12f   :  { %vm339_vm5 = vweird.f32 %v2555_v46  ;;  %v502_v29 = vmul.f32 %v2460_v58, %v465_v0  ;;  %v435_v31 = vmul.f32 %v2694_v33, %v434_v26  ;;  %v485_v40 = vmul.f32 %v2482_v23, %v448_v52  ;;  %vm2790_vm14 = vmor %vm429_vm3, %vm430_vm4  ;;  %v3785_v26 = vld [vmem:[#allocation3_spill] sm:$0xff] }
 0x130   :  { %v503_v41 = vmul.f32 %v2482_v23, %v466_v42  ;;  %v412_v43 = vsel %vm2702_vm0, %v2542_v24, %v408_v3  ;;  %v336_v55 = vmul.f32 0.5, %v335_v17  ;;  %v521_v14 = vadd.f32 %v2485_v53, %v484_v47 }
 0x131   :  { %v449_v49 = vmul.f32 %v322_v9, %v2213_v61  ;;  %v332_v48 = vsel %vm2712_vm1, %v2526_v34, %v328_v20  ;;  %v356_v32 = vmul.f32 0.5, %v355_v10  ;;  %v436_v28 = vmul.f32 0.5, %v435_v31 }
 0x132   :  { %v467_v24 = vmul.f32 %v412_v43, %v2233_v21  ;;  %v450_v3 = vmul.f32 %v322_v9, %v2216_v62  ;;  %v348_v61 = vmul.f32 %v2574_v18, %v347_v63  ;;  %607 = vmatmul.f32.gmra.mxu0 %v521_v14  ;;  %v539_v4 = vadd.f32 %v2485_v53, %v502_v29  ;;  %v3786_v63 = vld [vmem:[#allocation11_spill] sm:$0xff] }
 0x133   :  { %v468_v34 = vmul.f32 %v412_v43, %v2236_v22  ;;  %v451_v51 = vmul.f32 %v332_v48, %v2252_v50  ;;  %v437_v57 = vsub.f32 1.5, %v436_v28  ;;  %vm439_vm7 = vweird.f32 %v2635_v56  ;;  %v3788_v43 = vld [vmem:[#allocation12_spill] sm:$0xff]  ;;  %v3793_v22 = vld [vmem:[#allocation6_spill] sm:$0xff] }
 0x134   :  { %v522_v8 = vadd.f32 %v2496_v45, %v485_v40  ;;  %v540_v15 = vadd.f32 %v2496_v45, %v503_v41  ;;  %v337_v37 = vsub.f32 1.5, %v336_v55  ;;  %vm440_vm8 = vweird.f32 %v2694_v33  ;;  %634 = vmatmul.f32.gmra.mxu2 %v539_v4  ;;  %v3787_v40 = vld [vmem:[#allocation8_spill] sm:$0xff] }
 0x135   :  { %v486_v62 = vmul.f32 %v2460_v58, %v449_v49  ;;  %v422_v21 = vsel %vm2743_vm6, %v2522_v35, %v418_v60  ;;  %v427_v50 = vsub.f32 1.5, %v426_v19  ;;  %v357_v38 = vsub.f32 1.5, %v356_v32  ;;  %vm2781_vm13 = vmor %vm439_vm7, %vm440_vm8  ;;  %v3789_v32 = vld [vmem:[#allocation13_spill] sm:$0xff] }
 0x136   :  { %672 = vmatmul.f32.gmra.mxu1 %v522_v8  ;;  %699 = vmatmul.f32.gmra.mxu3 %v540_v15  ;;  %v504_v1 = vmul.f32 %v2460_v58, %v467_v24  ;;  %v487_v44 = vmul.f32 %v2482_v23, %v450_v3  ;;  %vm340_vm10 = vweird.f32 %v2618_v11  ;;  %v438_v35 = vmul.f32 %v2694_v33, %v437_v57 }
 0x137   :  { %v505_v36 = vmul.f32 %v2482_v23, %v468_v34  ;;  %v488_v5 = vmul.f32 %v2460_v58, %v451_v51  ;;  %vm359_vm11 = vweird.f32 %v2615_v54  ;;  %vm360_vm12 = vweird.f32 %v2674_v16  ;;  %vm341_vm15 = vmor %vm339_vm5, %vm340_vm10  ;;  %v3791_v34 = vld [vmem:[#allocation5_spill] sm:$0xff] }
 0x138   :  { %v469_v0 = vmul.f32 %v422_v21, %v3778_v59  ;;  %v338_v54 = vmul.f32 %v2618_v11, %v337_v37  ;;  %v523_v7 = vadd.f32 %v2485_v53, %v486_v62  ;;  %v352_v56 = vsel %vm2765_vm9, %v2574_v18, %v348_v61  ;;  %vm2805_vm0 = vmor %vm359_vm11, %vm360_vm12  ;;  %v3790_v61 = vld [vmem:[#allocation14_spill] sm:$0xff]  ;;  %v3792_v62 = vld [vmem:[#allocation9_spill] sm:$0xff] }
 0x139   :  { %v428_v12 = vmul.f32 %v2602_v39, %v427_v50  ;;  %v358_v6 = vmul.f32 %v2674_v16, %v357_v38  ;;  %v541_v27 = vadd.f32 %v2485_v53, %v504_v1  ;;  %v524_v42 = vadd.f32 %v2496_v45, %v487_v44 }
 0x13a   :  { %610 = vmatmul.f32.gmra.mxu0 %v523_v7  ;;  %v542_v20 = vadd.f32 %v2496_v45, %v505_v36  ;;  %v525_v18 = vadd.f32 %v2485_v53, %v488_v5  ;;  %v455_v17 = vmul.f32 %v352_v56, %v3783_v13  ;;  %v442_v46 = vsel %vm2781_vm13, %v2694_v33, %v438_v35  ;;  %v3794_v35 = vld [vmem:[#allocation10_spill] sm:$0xff] }
 0x13b   :  { %v506_v47 = vmul.f32 %v2460_v58, %v469_v0  ;;  %v452_v10 = vmul.f32 %v332_v48, %v3784_v2  ;;  %v470_v9 = vmul.f32 %v422_v21, %v3785_v26  ;;  %v473_v19 = vmul.f32 %v442_v46, %v3786_v63 }
 0x13c   :  { %637 = vmatmul.f32.gmra.mxu2 %v541_v27  ;;  %v342_v29 = vsel %vm341_vm15, %v2618_v11, %v338_v54  ;;  %v492_v31 = vmul.f32 %v2460_v58, %v455_v17  ;;  %v456_v41 = vmul.f32 %v352_v56, %v3787_v40  ;;  %v474_v55 = vmul.f32 %v442_v46, %v3788_v43 }
 0x13d   :  { %v432_v33 = vsel %vm2790_vm14, %v2602_v39, %v428_v12  ;;  %v510_v14 = vmul.f32 %v2460_v58, %v473_v19  ;;  %v362_v49 = vsel %vm2805_vm0, %v2674_v16, %v358_v6  ;;  %v489_v24 = vmul.f32 %v2482_v23, %v452_v10 }
 0x13e   :  { %675 = vmatmul.f32.gmra.mxu1 %v524_v42  ;;  %702 = vmatmul.f32.gmra.mxu3 %v542_v20  ;;  %v529_v11 = vadd.f32 %v2485_v53, %v492_v31  ;;  %v493_v48 = vmul.f32 %v2482_v23, %v456_v41  ;;  %v511_v30 = vmul.f32 %v2482_v23, %v474_v55  ;;  %vm717_vm1 = vcmask 261120  }
 0x13f   :  { %v457_v28 = vmul.f32 %v362_v49, %v3789_v32  ;;  %v507_v3 = vmul.f32 %v2482_v23, %v470_v9  ;;  %v547_v39 = vadd.f32 %v2485_v53, %v510_v14  ;;  %v458_v4 = vmul.f32 %v362_v49, %v3790_v61 }
 0x140   :  { %v453_v51 = vmul.f32 %v342_v29, %v3791_v34  ;;  %v530_v16 = vadd.f32 %v2496_v45, %v493_v48  ;;  %v548_v57 = vadd.f32 %v2496_v45, %v511_v30  ;;  %v543_v37 = vadd.f32 %v2485_v53, %v506_v47 }
 0x141   :  { %v494_v8 = vmul.f32 %v2460_v58, %v457_v28  ;;  %v495_v15 = vmul.f32 %v2482_v23, %v458_v4  ;;  %v471_v21 = vmul.f32 %v432_v33, %v3792_v62  ;;  %v454_v50 = vmul.f32 %v342_v29, %v3793_v22 }
 0x142   :  { %613 = vmatmul.f32.gmra.mxu0 %v525_v18  ;;  %v526_v1 = vadd.f32 %v2496_v45, %v489_v24  ;;  %v544_v44 = vadd.f32 %v2496_v45, %v507_v3  ;;  %v472_v36 = vmul.f32 %v432_v33, %v3794_v35  ;;  %v490_v25 = vmul.f32 %v2460_v58, %v453_v51 }
 0x143   :  { %v531_v38 = vadd.f32 %v2485_v53, %v494_v8  ;;  %v532_v5 = vadd.f32 %v2496_v45, %v495_v15  ;;  %v508_v59 = vmul.f32 %v2460_v58, %v471_v21  ;;  %v491_v0 = vmul.f32 %v2482_v23, %v454_v50  ;;  %v2862_v58 = vld [vmem:[%s3719_s4] ss:$0 sm:$0xff] }
 0x144   :  { %640 = vmatmul.f32.gmra.mxu2 %v543_v37  ;;  %v509_v52 = vmul.f32 %v2482_v23, %v472_v36  ;;  %v527_v54 = vadd.f32 %v2485_v53, %v490_v25 }
 0x145   :  { %v545_v7 = vadd.f32 %v2485_v53, %v508_v59  ;;  %v528_v56 = vadd.f32 %v2496_v45, %v491_v0 }
 0x146   :  { %678 = vmatmul.f32.gmra.mxu1 %v526_v1  ;;  %705 = vmatmul.f32.gmra.mxu3 %v544_v44  ;;  %v546_v12 = vadd.f32 %v2496_v45, %v509_v52 }
 0x14a   :  { %616 = vmatmul.f32.gmra.mxu0 %v527_v54 }
 0x14c   :  { %643 = vmatmul.f32.gmra.mxu2 %v545_v7 }
 0x14e   :  { %681 = vmatmul.f32.gmra.mxu1 %v528_v56  ;;  %708 = vmatmul.f32.gmra.mxu3 %v546_v12 }
 0x152   :  { %619 = vmatmul.f32.gmra.mxu0 %v529_v11 }
 0x154   :  { %646 = vmatmul.f32.gmra.mxu2 %v547_v39 }
 0x156   :  { %684 = vmatmul.f32.gmra.mxu1 %v530_v16  ;;  %711 = vmatmul.f32.gmra.mxu3 %v548_v57 }
 0x15a   :  { %622 = vmatmul.f32.gmra.mxu0 %v531_v38 }
 0x15e   :  { %687 = vmatmul.f32.gmra.mxu1 %v532_v5 }
 0x196   :  { %v626_v23 = vpop.f32.mrf.mxu2 }
 0x197   :  { %v627_v53 = vadd.f32 %v2862_v58, %v626_v23 }
 0x198   :  { %v691_v6 = vpop.f32.mrf.mxu3 }
 0x199   :  { %v2865_v27 = vadd.f32 %v691_v6, %v627_v53 }
 0x19b   :  { %1165 = vrot.lane.b32.xlu0 %v2865_v27, %s1886_s20  ;;  %v602_v45 = vpop.f32.mrf.mxu0  ;;  %v742_v31 = vsel %vm717_vm1, %v2865_v27, 0.0 }
 0x19c   :  { %v603_v42 = vadd.f32 %v2862_v58, %v602_v45 }
 0x19e   :  { %v667_v60 = vpop.f32.mrf.mxu1 }
 0x19f   :  { %v2870_v20 = vadd.f32 %v667_v60, %v603_v42  ;;  %v1887_v60 = vmov 32.0  }
 0x1a0   :  { %1818 = vrcp.f32 %v1887_v60 }
 0x1a1   :  { %1149 = vrot.lane.b32.xlu1 %v2870_v20, %s1886_s20  ;;  %v718_v18 = vsel %vm717_vm1, %v2870_v20, 0.0 }
 0x1a2   :  { %719 = vadd.xlane.f32.xlu2 %v718_v18 }
 0x1a4   :  { %v629_v2 = vpop.f32.mrf.mxu2 }
 0x1a5   :  { %v630_v10 = vadd.f32 %v2862_v58, %v629_v2 }
 0x1a6   :  { %v694_v26 = vpop.f32.mrf.mxu3 }
 0x1a7   :  { %v605_v13 = vpop.f32.mrf.mxu0  ;;  %v2882_v9 = vadd.f32 %v694_v26, %v630_v10 }
 0x1a8   :  { %v606_v17 = vadd.f32 %v2862_v58, %v605_v13  ;;  %v1819_v13 = vpop.eup %1818 }
 0x1a9   :  { %v745_v11 = vsel %vm717_vm1, %v2882_v9, 0.0  ;;  %vm771_vm2 = vweird.f32 %v1819_v13 }
 0x1aa   :  { %v670_v46 = vpop.f32.mrf.mxu1 }
 0x1ab   :  { %v2877_v47 = vadd.f32 %v670_v46, %v606_v17  ;;  %v767_v17 = vmul.f32 32.0, %v1819_v13 }
 0x1ad   :  { %v721_v63 = vsel %vm717_vm1, %v2877_v47, 0.0  ;;  %v768_v2 = vsub.f32 1.0, %v767_v17 }
 0x1af   :  { %v608_v19 = vpop.f32.mrf.mxu0  ;;  %v632_v55 = vpop.f32.mrf.mxu2  ;;  %v769_v26 = vmul.f32 %v1819_v13, %v768_v2 }
 0x1b0   :  { %v609_v29 = vadd.f32 %v2862_v58, %v608_v19  ;;  %v633_v33 = vadd.f32 %v2862_v58, %v632_v55  ;;  %v697_v14 = vpop.f32.mrf.mxu3 }
 0x1b2   :  { %v2898_v49 = vadd.f32 %v697_v14, %v633_v33 }
 0x1b3   :  { %v673_v40 = vpop.f32.mrf.mxu1 }
 0x1b4   :  { %v2891_v41 = vadd.f32 %v673_v40, %v609_v29  ;;  %v748_v24 = vsel %vm717_vm1, %v2898_v49, 0.0 }
 0x1b6   :  { %v724_v43 = vsel %vm717_vm1, %v2891_v41, 0.0 }
 0x1b7   :  { %v611_v48 = vpop.f32.mrf.mxu0  ;;  %v635_v3 = vpop.f32.mrf.mxu2 }
 0x1b8   :  { %v612_v30 = vadd.f32 %v2862_v58, %v611_v48  ;;  %v636_v39 = vadd.f32 %v2862_v58, %v635_v3 }
 0x1b9   :  { %v700_v61 = vpop.f32.mrf.mxu3 }
 0x1ba   :  { %1151 = vrot.lane.b32.xlu2 %v2877_v47, %s1886_s20  ;;  %v2912_v4 = vadd.f32 %v700_v61, %v636_v39 }
 0x1bb   :  { %v676_v32 = vpop.f32.mrf.mxu1 }
 0x1bc   :  { %v2905_v28 = vadd.f32 %v676_v32, %v612_v30  ;;  %v751_v34 = vsel %vm717_vm1, %v2912_v4, 0.0 }
 0x1be   :  { %v727_v57 = vsel %vm717_vm1, %v2905_v28, 0.0 }
 0x1bf   :  { %v614_v51 = vpop.f32.mrf.mxu0  ;;  %v638_v37 = vpop.f32.mrf.mxu2 }
 0x1c0   :  { %v615_v16 = vadd.f32 %v2862_v58, %v614_v51  ;;  %v639_v62 = vadd.f32 %v2862_v58, %v638_v37 }
 0x1c1   :  { %v703_v22 = vpop.f32.mrf.mxu3 }
 0x1c2   :  { %1167 = vrot.lane.b32.xlu2 %v2882_v9, %s1886_s20  ;;  %v2928_v50 = vadd.f32 %v703_v22, %v639_v62 }
 0x1c3   :  { %v679_v8 = vpop.f32.mrf.mxu1 }
 0x1c4   :  { %v2921_v15 = vadd.f32 %v679_v8, %v615_v16  ;;  %v754_v59 = vsel %vm717_vm1, %v2928_v50, 0.0 }
 0x1c5   :  { %722 = vadd.xlane.f32.xlu0 %v721_v63 }
 0x1c6   :  { %v730_v21 = vsel %vm717_vm1, %v2921_v15, 0.0 }
 0x1c7   :  { %v617_v38 = vpop.f32.mrf.mxu0  ;;  %v641_v5 = vpop.f32.mrf.mxu2 }
 0x1c8   :  { %v618_v1 = vadd.f32 %v2862_v58, %v617_v38  ;;  %v642_v25 = vadd.f32 %v2862_v58, %v641_v5 }
 0x1c9   :  { %v706_v0 = vpop.f32.mrf.mxu3 }
 0x1ca   :  { %v2942_v52 = vadd.f32 %v706_v0, %v642_v25 }
 0x1cb   :  { %743 = vadd.xlane.f32.xlu1 %v742_v31  ;;  %v682_v44 = vpop.f32.mrf.mxu1  ;;  %v770_v31 = vadd.f32 %v1819_v13, %v769_v26 }
 0x1cc   :  { %v2933_v35 = vadd.f32 %v682_v44, %v618_v1  ;;  %v757_v7 = vsel %vm717_vm1, %v2942_v52, 0.0 }
 0x1cd   :  { %v2965_v55 = vsel %vm771_vm2, %v1819_v13, %v770_v31 }
 0x1ce   :  { %v733_v36 = vsel %vm717_vm1, %v2933_v35, 0.0 }
 0x1cf   :  { %v620_v54 = vpop.f32.mrf.mxu0  ;;  %v644_v53 = vpop.f32.mrf.mxu2 }
 0x1d0   :  { %v621_v56 = vadd.f32 %v2862_v58, %v620_v54  ;;  %v645_v6 = vadd.f32 %v2862_v58, %v644_v53 }
 0x1d1   :  { %v709_v45 = vpop.f32.mrf.mxu3 }
 0x1d2   :  { %v2954_v42 = vadd.f32 %v709_v45, %v645_v6 }
 0x1d3   :  { %725 = vadd.xlane.f32.xlu1 %v724_v43  ;;  %v685_v12 = vpop.f32.mrf.mxu1 }
 0x1d4   :  { %v2949_v23 = vadd.f32 %v685_v12, %v621_v56  ;;  %v760_v18 = vsel %vm717_vm1, %v2954_v42, 0.0 }
 0x1d6   :  { %v736_v63 = vsel %vm717_vm1, %v2949_v23, 0.0 }
 0x1d7   :  { %v623_v10 = vpop.f32.mrf.mxu0  ;;  %v647_v30 = vpop.f32.mrf.mxu2 }
 0x1d8   :  { %v624_v29 = vadd.f32 %v2862_v58, %v623_v10  ;;  %v648_v3 = vadd.f32 %v2862_v58, %v647_v30 }
 0x1d9   :  { %1153 = vrot.lane.b32.xlu0 %v2891_v41, %s1886_s20  ;;  %v712_v61 = vpop.f32.mrf.mxu3 }
 0x1da   :  { %v2979_v51 = vadd.f32 %v712_v61, %v648_v3 }
 0x1db   :  { %v688_v40 = vpop.f32.mrf.mxu1 }
 0x1dc   :  { %v2963_v43 = vadd.f32 %v688_v40, %v624_v29  ;;  %v763_v26 = vsel %vm717_vm1, %v2979_v51, 0.0 }
 0x1de   :  { %v739_v48 = vsel %vm717_vm1, %v2963_v43, 0.0 }
 0x1eb   :  { %746 = vadd.xlane.f32.xlu2 %v745_v11 }
 0x1ec   :  { %1169 = vrot.lane.b32.xlu1 %v2898_v49, %s1886_s20 }
 0x203   :  { %749 = vadd.xlane.f32.xlu0 %v748_v24  ;;  %1155 = vrot.lane.b32.xlu2 %v2905_v28, %s1886_s20 }
 0x20d   :  { %v1166_v1 = vpop.permute.xlu0 %1165 }
 0x213   :  { %v1150_v32 = vpop.permute.xlu1 %1149 }
 0x214   :  { %v1197_v0 = vsel %vm717_vm1, %v1150_v32, 0.0  ;;  %v1221_v32 = vsel %vm717_vm1, %v1166_v1, 0.0 }
 0x215   :  { %v720_v46 = vpop.xlane.xlu2 %719 }
 0x216   :  { %752 = vadd.xlane.f32.xlu1 %v751_v34  ;;  %v773_v33 = vmul.f32 %v2965_v55, %v720_v46 }
 0x217   :  { %1171 = vrot.lane.b32.xlu0 %v2912_v4, %s1886_s20 }
 0x218   :  { %v2971_v11 = vsub.f32 %v2870_v20, %v773_v33 }
 0x21a   :  { %v805_v24 = vmul.f32 %v2971_v11, %v2971_v11 }
 0x21c   :  { %v821_v34 = vsel %vm717_vm1, %v805_v24, 0.0 }
 0x21d   :  { %v1152_v19 = vpop.permute.xlu2 %1151 }
 0x21e   :  { %v1200_v62 = vsel %vm717_vm1, %v1152_v19, 0.0 }
 0x225   :  { %v1168_v14 = vpop.permute.xlu2 %1167 }
 0x226   :  { %v1224_v60 = vsel %vm717_vm1, %v1168_v14, 0.0 }
 0x22c   :  { %728 = vadd.xlane.f32.xlu2 %v727_v57 }
 0x22f   :  { %1157 = vrot.lane.b32.xlu1 %v2921_v15, %s1886_s20 }
 0x238   :  { %v723_v54 = vpop.xlane.xlu0 %722 }
 0x239   :  { %v774_v12 = vmul.f32 %v2965_v55, %v723_v54 }
 0x23b   :  { %v3002_v45 = vsub.f32 %v2877_v47, %v774_v12 }
 0x23d   :  { %v806_v46 = vmul.f32 %v3002_v45, %v3002_v45 }
 0x23e   :  { %v744_v16 = vpop.xlane.xlu1 %743 }
 0x23f   :  { %v781_v40 = vmul.f32 %v2965_v55, %v744_v16 }
 0x241   :  { %731 = vadd.xlane.f32.xlu0 %v730_v21 }
 0x244   :  { %1173 = vrot.lane.b32.xlu2 %v2928_v50, %s1886_s20 }
 0x246   :  { %v726_v21 = vpop.xlane.xlu1 %725 }
 0x255   :  { %1159 = vrot.lane.b32.xlu0 %v2933_v35, %s1886_s20 }
 0x259   :  { %734 = vadd.xlane.f32.xlu1 %v733_v36 }
 0x25e   :  { %v747_v39 = vpop.xlane.xlu2 %746  ;;  %v1170_v36 = vpop.permute.xlu1 %1169 }
 0x25f   :  { %v782_v57 = vmul.f32 %v2965_v55, %v747_v39  ;;  %v1227_v25 = vsel %vm717_vm1, %v1170_v36, 0.0 }
 0x261   :  { %v2985_v37 = vsub.f32 %v2882_v9, %v782_v57 }
 0x263   :  { %v814_v58 = vmul.f32 %v2985_v37, %v2985_v37 }
 0x265   :  { %v848_v38 = vsel %vm717_vm1, %v814_v58, 0.0 }
 0x266   :  { %v1156_v8 = vpop.permute.xlu2 %1155 }
 0x267   :  { %v1206_v24 = vsel %vm717_vm1, %v1156_v8, 0.0  ;;  %v775_v8 = vmul.f32 %v2965_v55, %v726_v21 }
 0x26d   :  { %755 = vadd.xlane.f32.xlu2 %v754_v59 }
 0x272   :  { %1175 = vrot.lane.b32.xlu1 %v2942_v52, %s1886_s20 }
 0x27f   :  { %758 = vadd.xlane.f32.xlu0 %v757_v7 }
 0x285   :  { %1161 = vrot.lane.b32.xlu2 %v2949_v23, %s1886_s20 }
 0x289   :  { %v753_v56 = vpop.xlane.xlu1 %752 }
 0x293   :  { %1177 = vrot.lane.b32.xlu0 %v2954_v42, %s1886_s20 }
 0x29c   :  { %761 = vadd.xlane.f32.xlu1 %v760_v18  ;;  %v1154_v18 = vpop.permute.xlu0 %1153 }
 0x29f   :  { %v729_v22 = vpop.xlane.xlu2 %728 }
 0x2a0   :  { %v776_v44 = vmul.f32 %v2965_v55, %v729_v22 }
 0x2a1   :  { %v1158_v17 = vpop.permute.xlu1 %1157 }
 0x2a2   :  { %v2993_v5 = vsub.f32 %v2905_v28, %v776_v44  ;;  %v1209_v10 = vsel %vm717_vm1, %v1158_v17, 0.0  ;;  %v1203_v44 = vsel %vm717_vm1, %v1154_v18, 0.0 }
 0x2a4   :  { %v808_v7 = vmul.f32 %v2993_v5, %v2993_v5  ;;  %v750_v19 = vpop.xlane.xlu0 %749 }
 0x2a5   :  { %v783_v33 = vmul.f32 %v2965_v55, %v750_v19 }
 0x2a6   :  { %v830_v53 = vsel %vm717_vm1, %v808_v7, 0.0 }
 0x2a7   :  { %v1174_v59 = vpop.permute.xlu2 %1173  ;;  %v3024_v30 = vsub.f32 %v2898_v49, %v783_v33 }
 0x2a8   :  { %v1233_v36 = vsel %vm717_vm1, %v1174_v59, 0.0 }
 0x2ac   :  { %v1172_v3 = vpop.permute.xlu0 %1171 }
 0x2ae   :  { %737 = vadd.xlane.f32.xlu2 %v736_v63  ;;  %v824_v63 = vsel %vm717_vm1, %v806_v46, 0.0 }
 0x2b4   :  { %v732_v58 = vpop.xlane.xlu0 %731 }
 0x2b5   :  { %1163 = vrot.lane.b32.xlu1 %v2963_v43, %s1886_s20  ;;  %v777_v22 = vmul.f32 %v2965_v55, %v732_v58 }
 0x2b7   :  { %v3041_v1 = vsub.f32 %v2921_v15, %v777_v22 }
 0x2b9   :  { %v809_v21 = vmul.f32 %v3041_v1, %v3041_v1 }
 0x2bb   :  { %v833_v7 = vsel %vm717_vm1, %v809_v21, 0.0 }
 0x2bd   :  { %740 = vadd.xlane.f32.xlu0 %v739_v48  ;;  %v3021_v48 = vsub.f32 %v2865_v27, %v781_v40 }
 0x2bf   :  { %v813_v61 = vmul.f32 %v3021_v48, %v3021_v48 }
 0x2c1   :  { %v845_v57 = vsel %vm717_vm1, %v813_v61, 0.0 }
 0x2c5   :  { %822 = vadd.xlane.f32.xlu0 %v821_v34  ;;  %v815_v34 = vmul.f32 %v3024_v30, %v3024_v30 }
 0x2c6   :  { %1179 = vrot.lane.b32.xlu2 %v2979_v51, %s1886_s20 }
 0x2cc   :  { %v735_v31 = vpop.xlane.xlu1 %734 }
 0x2cd   :  { %1201 = vadd.xlane.f32.xlu0 %v1200_v62  ;;  %v851_v62 = vsel %vm717_vm1, %v815_v34, 0.0  ;;  %v778_v19 = vmul.f32 %v2965_v55, %v735_v31 }
 0x2d5   :  { %849 = vadd.xlane.f32.xlu0 %v848_v38  ;;  %v3038_v38 = vsub.f32 %v2891_v41, %v775_v8 }
 0x2dd   :  { %1228 = vadd.xlane.f32.xlu0 %v1227_v25  ;;  %v1160_v25 = vpop.permute.xlu0 %1159 }
 0x2df   :  { %1198 = vadd.xlane.f32.xlu1 %v1197_v0  ;;  %v807_v0 = vmul.f32 %v3038_v38, %v3038_v38 }
 0x2e0   :  { %v756_v6 = vpop.xlane.xlu2 %755 }
 0x2e1   :  { %v785_v13 = vmul.f32 %v2965_v55, %v756_v6  ;;  %v827_v54 = vsel %vm717_vm1, %v807_v0, 0.0 }
 0x2e3   :  { %v3009_v2 = vsub.f32 %v2928_v50, %v785_v13  ;;  %v1230_v13 = vsel %vm717_vm1, %v1172_v3, 0.0 }
 0x2e4   :  { %v1176_v39 = vpop.permute.xlu1 %1175 }
 0x2e5   :  { %831 = vadd.xlane.f32.xlu0 %v830_v53  ;;  %v817_v29 = vmul.f32 %v3009_v2, %v3009_v2  ;;  %v1236_v16 = vsel %vm717_vm1, %v1176_v39, 0.0  ;;  %v784_v53 = vmul.f32 %v2965_v55, %v753_v56 }
 0x2e7   :  { %1225 = vadd.xlane.f32.xlu1 %v1224_v60  ;;  %v857_v14 = vsel %vm717_vm1, %v817_v29, 0.0  ;;  %v3054_v60 = vsub.f32 %v2912_v4, %v784_v53 }
 0x2e8   :  { %v1162_v6 = vpop.permute.xlu2 %1161 }
 0x2e9   :  { %v1215_v17 = vsel %vm717_vm1, %v1162_v6, 0.0  ;;  %v816_v46 = vmul.f32 %v3054_v60, %v3054_v60 }
 0x2ed   :  { %1210 = vadd.xlane.f32.xlu0 %v1209_v10  ;;  %v854_v10 = vsel %vm717_vm1, %v816_v46, 0.0 }
 0x2ef   :  { %764 = vadd.xlane.f32.xlu2 %v763_v26  ;;  %825 = vadd.xlane.f32.xlu1 %v824_v63 }
 0x2f2   :  { %v759_v12 = vpop.xlane.xlu0 %758 }
 0x2f3   :  { %v786_v59 = vmul.f32 %v2965_v55, %v759_v12 }
 0x2f5   :  { %858 = vadd.xlane.f32.xlu0 %v857_v14  ;;  %v3057_v18 = vsub.f32 %v2942_v52, %v786_v59  ;;  %v3073_v14 = vsub.f32 %v2933_v35, %v778_v19 }
 0x2f7   :  { %1222 = vadd.xlane.f32.xlu2 %v1221_v32  ;;  %1207 = vadd.xlane.f32.xlu1 %v1206_v24  ;;  %v818_v56 = vmul.f32 %v3057_v18, %v3057_v18  ;;  %v1212_v32 = vsel %vm717_vm1, %v1160_v25, 0.0  ;;  %v810_v34 = vmul.f32 %v3073_v14, %v3073_v14 }
 0x2f9   :  { %v860_v26 = vsel %vm717_vm1, %v818_v56, 0.0 }
 0x2fd   :  { %1237 = vadd.xlane.f32.xlu0 %v1236_v16 }
 0x2ff   :  { %846 = vadd.xlane.f32.xlu2 %v845_v57  ;;  %852 = vadd.xlane.f32.xlu1 %v851_v62  ;;  %v836_v57 = vsel %vm717_vm1, %v810_v34, 0.0 }
 0x305   :  { %v1178_v3 = vpop.permute.xlu0 %1177 }
 0x306   :  { %v1239_v0 = vsel %vm717_vm1, %v1178_v3, 0.0  ;;  %v3110_v3 = vld [vmem:[%s3723_s6] ss:$0 sm:$0xff] }
 0x307   :  { %1204 = vadd.xlane.f32.xlu2 %v1203_v44  ;;  %1234 = vadd.xlane.f32.xlu1 %v1233_v36 }
 0x30f   :  { %828 = vadd.xlane.f32.xlu2 %v827_v54  ;;  %834 = vadd.xlane.f32.xlu1 %v833_v7  ;;  %v762_v33 = vpop.xlane.xlu1 %761 }
 0x310   :  { %v787_v22 = vmul.f32 %v2965_v55, %v762_v33  ;;  %v3104_v33 = vld [vmem:[%s3722_s5] ss:$0 sm:$0xff] }
 0x312   :  { %v3092_v25 = vsub.f32 %v2954_v42, %v787_v22 }
 0x314   :  { %v819_v53 = vmul.f32 %v3092_v25, %v3092_v25 }
 0x316   :  { %v863_v59 = vsel %vm717_vm1, %v819_v53, 0.0 }
 0x317   :  { %1231 = vadd.xlane.f32.xlu2 %v1230_v13  ;;  %1216 = vadd.xlane.f32.xlu1 %v1215_v17 }
 0x31f   :  { %855 = vadd.xlane.f32.xlu2 %v854_v10  ;;  %861 = vadd.xlane.f32.xlu1 %v860_v26 }
 0x321   :  { %v738_v63 = vpop.xlane.xlu2 %737 }
 0x322   :  { %v779_v29 = vmul.f32 %v2965_v55, %v738_v63 }
 0x324   :  { %v3070_v40 = vsub.f32 %v2949_v23, %v779_v29 }
 0x326   :  { %v811_v24 = vmul.f32 %v3070_v40, %v3070_v40 }
 0x327   :  { %1213 = vadd.xlane.f32.xlu2 %v1212_v32  ;;  %v1164_v16 = vpop.permute.xlu1 %1163 }
 0x328   :  { %v839_v39 = vsel %vm717_vm1, %v811_v24, 0.0  ;;  %v1218_v58 = vsel %vm717_vm1, %v1164_v16, 0.0 }
 0x329   :  { %840 = vadd.xlane.f32.xlu0 %v839_v39  ;;  %v1180_v31 = vpop.permute.xlu2 %1179 }
 0x32a   :  { %v1242_v61 = vsel %vm717_vm1, %v1180_v31, 0.0 }
 0x32b   :  { %1243 = vadd.xlane.f32.xlu1 %v1242_v61 }
 0x32f   :  { %837 = vadd.xlane.f32.xlu2 %v836_v57 }
 0x330   :  { %v741_v62 = vpop.xlane.xlu0 %740 }
 0x331   :  { %v780_v8 = vmul.f32 %v2965_v55, %v741_v62  ;;  %1219 = vadd.xlane.f32.xlu0 %v1218_v58 }
 0x333   :  { %v3087_v44 = vsub.f32 %v2963_v43, %v780_v8 }
 0x335   :  { %v812_v36 = vmul.f32 %v3087_v44, %v3087_v44 }
 0x337   :  { %v842_v21 = vsel %vm717_vm1, %v812_v36, 0.0  ;;  %1240 = vadd.xlane.f32.xlu2 %v1239_v0 }
 0x338   :  { %843 = vadd.xlane.f32.xlu1 %v842_v21  ;;  %v823_v54 = vpop.xlane.xlu0 %822 }
 0x339   :  { %v869_v7 = vmul.f32 %v823_v54, %v2965_v55 }
 0x33b   :  { %v885_v12 = vadd.f32 1e-05, %v869_v7 }
 0x33d   :  { %1820 = vrsqrt.f32 %v885_v12  ;;  %vm907_vm4 = vweird.f32 %v885_v12 }
 0x33f   :  { %864 = vadd.xlane.f32.xlu2 %v863_v59 }
 0x340   :  { %v1202_v6 = vpop.xlane.xlu0 %1201 }
 0x341   :  { %v1246_v24 = vmul.f32 %v1202_v6, %v2965_v55 }
 0x343   :  { %v1821_v13 = vpop.eup %1820  ;;  %v3115_v34 = vsub.f32 %v2877_v47, %v1246_v24 }
 0x344   :  { %v902_v17 = vmul.f32 %v1821_v13, %v885_v12  ;;  %vm908_vm3 = vweird.f32 %v1821_v13 }
 0x345   :  { %vm909_vm5 = vmor %vm907_vm4, %vm908_vm3  ;;  %v1278_v22 = vmul.f32 %v3115_v34, %v3115_v34 }
 0x346   :  { %v903_v46 = vmul.f32 %v1821_v13, %v902_v17 }
 0x348   :  { %v904_v56 = vmul.f32 0.5, %v903_v46  ;;  %v850_v10 = vpop.xlane.xlu0 %849 }
 0x349   :  { %v878_v26 = vmul.f32 %v850_v10, %v2965_v55 }
 0x34a   :  { %v905_v63 = vsub.f32 1.5, %v904_v56 }
 0x34b   :  { %v894_v19 = vadd.f32 1e-05, %v878_v26 }
 0x34c   :  { %v906_v29 = vmul.f32 %v1821_v13, %v905_v63 }
 0x34d   :  { %1822 = vrsqrt.f32 %v894_v19  ;;  %vm997_vm7 = vweird.f32 %v894_v19 }
 0x34e   :  { %v910_v32 = vsel %vm909_vm5, %v1821_v13, %v906_v29 }
 0x34f   :  { %v1061_v39 = vmul.f32 %v910_v32, %v2971_v11 }
 0x350   :  { %v1229_v31 = vpop.xlane.xlu0 %1228 }
 0x351   :  { %v1080_v61 = vmul.f32 %v3104_v33, %v1061_v39  ;;  %v1255_v11 = vmul.f32 %v1229_v31, %v2965_v55 }
 0x352   :  { %v3118_v62 = vpop.xlane.xlu1 %1198 }
 0x353   :  { %v1823_v16 = vpop.eup %1822  ;;  %v1099_v57 = vadd.f32 %v3110_v3, %v1080_v61  ;;  %v3130_v54 = vsub.f32 %v2898_v49, %v1255_v11 }
 0x354   :  { %v992_v58 = vmul.f32 %v1823_v16, %v894_v19  ;;  %vm998_vm6 = vweird.f32 %v1823_v16 }
 0x355   :  { %1115 = vst.msk [vmem:[%s3724_s9] sm:$0xff] %vm717_vm1, %v1099_v57  ;;  %vm999_vm8 = vmor %vm997_vm7, %vm998_vm6  ;;  %v1287_v17 = vmul.f32 %v3130_v54, %v3130_v54 }
 0x356   :  { %v993_v8 = vmul.f32 %v1823_v16, %v992_v58 }
 0x357   :  { %1311 = vrot.lane.b32.xlu2 %v1278_v22, %s1886_s20 }
 0x358   :  { %v994_v36 = vmul.f32 0.5, %v993_v8  ;;  %v832_v47 = vpop.xlane.xlu0 %831 }
 0x359   :  { %v872_v0 = vmul.f32 %v832_v47, %v2965_v55 }
 0x35a   :  { %v995_v21 = vsub.f32 1.5, %v994_v36  ;;  %v1226_v7 = vpop.xlane.xlu1 %1225 }
 0x35b   :  { %v888_v12 = vadd.f32 1e-05, %v872_v0  ;;  %v1254_v59 = vmul.f32 %v1226_v7, %v2965_v55 }
 0x35c   :  { %v996_v53 = vmul.f32 %v1823_v16, %v995_v21 }
 0x35d   :  { %1824 = vrsqrt.f32 %v888_v12  ;;  %v3134_v13 = vsub.f32 %v2882_v9, %v1254_v59  ;;  %vm937_vm10 = vweird.f32 %v888_v12 }
 0x35e   :  { %v1000_v6 = vsel %vm999_vm8, %v1823_v16, %v996_v53 }
 0x35f   :  { %v1070_v46 = vmul.f32 %v1000_v6, %v2985_v37  ;;  %1329 = vrot.lane.b32.xlu2 %v1287_v17, %s1886_s20  ;;  %v1286_v49 = vmul.f32 %v3134_v13, %v3134_v13 }
 0x360   :  { %v1211_v56 = vpop.xlane.xlu0 %1210 }
 0x361   :  { %v1089_v10 = vmul.f32 %v3104_v33, %v1070_v46  ;;  %v1249_v26 = vmul.f32 %v1211_v56, %v2965_v55  ;;  %1327 = vrot.lane.b32.xlu1 %v1286_v49, %s1886_s20 }
 0x362   :  { %v765_v19 = vpop.xlane.xlu2 %764  ;;  %v826_v29 = vpop.xlane.xlu1 %825 }
 0x363   :  { %v1825_v63 = vpop.eup %1824  ;;  %v1108_v9 = vadd.f32 %v3110_v3, %v1089_v10  ;;  %v3147_v32 = vsub.f32 %v2921_v15, %v1249_v26  ;;  %v788_v24 = vmul.f32 %v2965_v55, %v765_v19  ;;  %v870_v39 = vmul.f32 %v826_v29, %v2965_v55 }
 0x364   :  { %v932_v37 = vmul.f32 %v1825_v63, %v888_v12  ;;  %vm938_vm9 = vweird.f32 %v1825_v63 }
 0x365   :  { %1124 = vst.msk [vmem:[%s3724_s9 + $0x48] sm:$0xff] %vm717_vm1, %v1108_v9  ;;  %v1281_v31 = vmul.f32 %v3147_v32, %v3147_v32  ;;  %v3158_v16 = vsub.f32 %v2979_v51, %v788_v24  ;;  %v886_v57 = vadd.f32 1e-05, %v870_v39  ;;  %vm939_vm11 = vmor %vm937_vm10, %vm938_vm9  ;;  %v1245_v39 = vmul.f32 %v3118_v62, %v2965_v55 }
 0x366   :  { %v933_v61 = vmul.f32 %v1825_v63, %v932_v37 }
 0x367   :  { %1826 = vrsqrt.f32 %v886_v57  ;;  %v820_v58 = vmul.f32 %v3158_v16, %v3158_v16  ;;  %1317 = vrot.lane.b32.xlu2 %v1281_v31, %s1886_s20  ;;  %vm917_vm13 = vweird.f32 %v886_v57 }
 0x368   :  { %v934_v15 = vmul.f32 0.5, %v933_v61  ;;  %v859_v8 = vpop.xlane.xlu0 %858 }
 0x369   :  { %v881_v11 = vmul.f32 %v859_v8, %v2965_v55  ;;  %v866_v36 = vsel %vm717_vm1, %v820_v58, 0.0 }
 0x36a   :  { %v935_v22 = vsub.f32 1.5, %v934_v15  ;;  %867 = vadd.xlane.f32.xlu0 %v866_v36  ;;  %v1223_v47 = vpop.xlane.xlu2 %1222  ;;  %v3165_v0 = vpop.xlane.xlu1 %1207 }
 0x36b   :  { %v897_v21 = vadd.f32 1e-05, %v881_v11  ;;  %v3188_v11 = vsub.f32 %v2870_v20, %v1245_v39 }
 0x36c   :  { %v936_v7 = vmul.f32 %v1825_v63, %v935_v22 }
 0x36d   :  { %1828 = vrsqrt.f32 %v897_v21  ;;  %v1827_v53 = vpop.eup %1826  ;;  %vm1027_vm0 = vweird.f32 %v897_v21  ;;  %v1277_v20 = vmul.f32 %v3188_v11, %v3188_v11 }
 0x36e   :  { %v940_v59 = vsel %vm939_vm11, %v1825_v63, %v936_v7  ;;  %v912_v17 = vmul.f32 %v1827_v53, %v886_v57  ;;  %vm918_vm12 = vweird.f32 %v1827_v53 }
 0x36f   :  { %v1064_v6 = vmul.f32 %v940_v59, %v2993_v5  ;;  %vm919_vm14 = vmor %vm917_vm13, %vm918_vm12 }
 0x370   :  { %v1238_v46 = vpop.xlane.xlu0 %1237  ;;  %v913_v56 = vmul.f32 %v1827_v53, %v912_v17 }
 0x371   :  { %v1083_v49 = vmul.f32 %v3104_v33, %v1064_v6  ;;  %v1258_v10 = vmul.f32 %v1238_v46, %v2965_v55 }
 0x372   :  { %v914_v19 = vmul.f32 0.5, %v913_v56  ;;  %v847_v29 = vpop.xlane.xlu2 %846  ;;  %v853_v37 = vpop.xlane.xlu1 %852 }
 0x373   :  { %v1829_v26 = vpop.eup %1828  ;;  %v1102_v9 = vadd.f32 %v3110_v3, %v1083_v49  ;;  %v3172_v12 = vsub.f32 %v2942_v52, %v1258_v10  ;;  %v877_v63 = vmul.f32 %v847_v29, %v2965_v55  ;;  %v879_v5 = vmul.f32 %v853_v37, %v2965_v55 }
 0x374   :  { %v1022_v24 = vmul.f32 %v1829_v26, %v897_v21  ;;  %v915_v31 = vsub.f32 1.5, %v914_v19  ;;  %vm1028_vm15 = vweird.f32 %v1829_v26  ;;  %v1253_v49 = vmul.f32 %v1223_v47, %v2965_v55 }
 0x375   :  { %1118 = vst.msk [vmem:[%s3724_s9 + $0x18] sm:$0xff] %vm717_vm1, %v1102_v9  ;;  %v1290_v61 = vmul.f32 %v3172_v12, %v3172_v12  ;;  %v893_v15 = vadd.f32 1e-05, %v877_v63  ;;  %v3184_v58 = vadd.f32 1e-05, %v879_v5  ;;  %vm1029_vm2 = vmor %vm1027_vm0, %vm1028_vm15 }
 0x376   :  { %v1023_v52 = vmul.f32 %v1829_v26, %v1022_v24  ;;  %v916_v8 = vmul.f32 %v1827_v53, %v915_v31 }
 0x377   :  { %1335 = vrot.lane.b32.xlu2 %v1290_v61, %s1886_s20  ;;  %1830 = vrsqrt.f32 %v893_v15  ;;  %vm987_vm5 = vweird.f32 %v893_v15  ;;  %vm1007_vm7 = vweird.f32 %v3184_v58 }
 0x378   :  { %v1024_v62 = vmul.f32 0.5, %v1023_v52  ;;  %v920_v22 = vsel %vm919_vm14, %v1827_v53, %v916_v8  ;;  %1832 = vrsqrt.f32 %v3184_v58 }
 0x379   :  { %v1062_v36 = vmul.f32 %v920_v22, %v3002_v45 }
 0x37a   :  { %v1025_v7 = vsub.f32 1.5, %v1024_v62  ;;  %v1205_v59 = vpop.xlane.xlu2 %1204  ;;  %v1235_v6 = vpop.xlane.xlu1 %1234  ;;  %v1248_v62 = vmul.f32 %v3165_v0, %v2965_v55 }
 0x37b   :  { %v1081_v17 = vmul.f32 %v3104_v33, %v1062_v36  ;;  %v1247_v46 = vmul.f32 %v1205_v59, %v2965_v55  ;;  %v1257_v21 = vmul.f32 %v1235_v6, %v2965_v55 }
 0x37c   :  { %v1026_v57 = vmul.f32 %v1829_v26, %v1025_v7 }
 0x37d   :  { %v1831_v53 = vpop.eup %1830  ;;  %v1100_v56 = vadd.f32 %v3110_v3, %v1081_v17  ;;  %v3199_v10 = vsub.f32 %v2891_v41, %v1247_v46  ;;  %v3212_v41 = vsub.f32 %v2865_v27, %v1253_v49  ;;  %v3218_v52 = vsub.f32 %v2928_v50, %v1257_v21 }
 0x37e   :  { %v1030_v45 = vsel %vm1029_vm2, %v1829_v26, %v1026_v57  ;;  %v1833_v9 = vpop.eup %1832  ;;  %v982_v29 = vmul.f32 %v1831_v53, %v893_v15  ;;  %1309 = vrot.lane.b32.xlu0 %v1277_v20, %s1886_s20  ;;  %vm988_vm3 = vweird.f32 %v1831_v53  ;;  %v3235_v57 = vsub.f32 %v2905_v28, %v1248_v62 }
 0x37f   :  { %v1073_v19 = vmul.f32 %v1030_v45, %v3009_v2  ;;  %1116 = vst.msk [vmem:[%s3724_s9 + $0x8] sm:$0xff] %vm717_vm1, %v1100_v56  ;;  %v1002_v47 = vmul.f32 %v1833_v9, %v3184_v58  ;;  %v1279_v26 = vmul.f32 %v3199_v10, %v3199_v10  ;;  %v1285_v36 = vmul.f32 %v3212_v41, %v3212_v41  ;;  %vm989_vm6 = vmor %vm987_vm5, %vm988_vm3 }
 0x380   :  { %v983_v37 = vmul.f32 %v1831_v53, %v982_v29  ;;  %vm1008_vm4 = vweird.f32 %v1833_v9  ;;  %v1289_v17 = vmul.f32 %v3218_v52, %v3218_v52 }
 0x381   :  { %v1092_v2 = vmul.f32 %v3104_v33, %v1073_v19  ;;  %v1003_v24 = vmul.f32 %v1833_v9, %v1002_v47  ;;  %1313 = vrot.lane.b32.xlu1 %v1279_v26, %s1886_s20  ;;  %vm1009_vm8 = vmor %vm1007_vm7, %vm1008_vm4 }
 0x382   :  { %v984_v5 = vmul.f32 0.5, %v983_v37  ;;  %v829_v39 = vpop.xlane.xlu2 %828  ;;  %v835_v31 = vpop.xlane.xlu1 %834 }
 0x383   :  { %v1111_v63 = vadd.f32 %v3110_v3, %v1092_v2  ;;  %v1004_v61 = vmul.f32 0.5, %v1003_v24  ;;  %v871_v8 = vmul.f32 %v829_v39, %v2965_v55  ;;  %v873_v27 = vmul.f32 %v835_v31, %v2965_v55 }
 0x384   :  { %v985_v22 = vsub.f32 1.5, %v984_v5 }
 0x385   :  { %1127 = vst.msk [vmem:[%s3724_s9 + $0x60] sm:$0xff] %vm717_vm1, %v1111_v63  ;;  %v1005_v7 = vsub.f32 1.5, %v1004_v61  ;;  %v887_v50 = vadd.f32 1e-05, %v871_v8  ;;  %v889_v59 = vadd.f32 1e-05, %v873_v27 }
 0x386   :  { %v986_v6 = vmul.f32 %v1831_v53, %v985_v22  ;;  %1325 = vrot.lane.b32.xlu0 %v1285_v36, %s1886_s20 }
 0x387   :  { %v1006_v0 = vmul.f32 %v1833_v9, %v1005_v7  ;;  %1834 = vrsqrt.f32 %v887_v50  ;;  %vm927_vm11 = vweird.f32 %v887_v50  ;;  %vm947_vm13 = vweird.f32 %v889_v59 }
 0x388   :  { %v990_v46 = vsel %vm989_vm6, %v1831_v53, %v986_v6  ;;  %1836 = vrsqrt.f32 %v889_v59  ;;  %v1280_v53 = vmul.f32 %v3235_v57, %v3235_v57 }
 0x389   :  { %v1069_v49 = vmul.f32 %v990_v46, %v3021_v48  ;;  %v1010_v20 = vsel %vm1009_vm8, %v1833_v9, %v1006_v0  ;;  %1333 = vrot.lane.b32.xlu1 %v1289_v17, %s1886_s20 }
 0x38a   :  { %v1071_v15 = vmul.f32 %v1010_v20, %v3024_v30  ;;  %v1232_v56 = vpop.xlane.xlu2 %1231  ;;  %v1217_v45 = vpop.xlane.xlu1 %1216 }
 0x38b   :  { %v1088_v58 = vmul.f32 %v3104_v33, %v1069_v49  ;;  %v1251_v19 = vmul.f32 %v1217_v45, %v2965_v55  ;;  %v1256_v28 = vmul.f32 %v1232_v56, %v2965_v55 }
 0x38c   :  { %v1090_v29 = vmul.f32 %v3104_v33, %v1071_v15 }
 0x38d   :  { %v1835_v47 = vpop.eup %1834  ;;  %v1107_v48 = vadd.f32 %v3110_v3, %v1088_v58  ;;  %v3248_v9 = vsub.f32 %v2949_v23, %v1251_v19  ;;  %v3263_v24 = vsub.f32 %v2912_v4, %v1256_v28 }
 0x38e   :  { %v1837_v30 = vpop.eup %1836  ;;  %v1109_v21 = vadd.f32 %v3110_v3, %v1090_v29  ;;  %v922_v26 = vmul.f32 %v1835_v47, %v887_v50  ;;  %1315 = vrot.lane.b32.xlu0 %v1280_v53, %s1886_s20  ;;  %vm928_vm9 = vweird.f32 %v1835_v47 }
 0x38f   :  { %1123 = vst.msk [vmem:[%s3724_s9 + $0x40] sm:$0xff] %vm717_vm1, %v1107_v48  ;;  %v942_v2 = vmul.f32 %v1837_v30, %v889_v59  ;;  %v1283_v37 = vmul.f32 %v3248_v9, %v3248_v9  ;;  %v1288_v22 = vmul.f32 %v3263_v24, %v3263_v24  ;;  %vm948_vm10 = vweird.f32 %v1837_v30  ;;  %vm929_vm12 = vmor %vm927_vm11, %vm928_vm9 }
 0x390   :  { %1125 = vst.msk [vmem:[%s3724_s9 + $0x50] sm:$0xff] %vm717_vm1, %v1109_v21  ;;  %v923_v23 = vmul.f32 %v1835_v47, %v922_v26  ;;  %vm949_vm14 = vmor %vm947_vm13, %vm948_vm10 }
 0x391   :  { %v943_v63 = vmul.f32 %v1837_v30, %v942_v2  ;;  %1321 = vrot.lane.b32.xlu1 %v1283_v37, %s1886_s20 }
 0x392   :  { %v924_v5 = vmul.f32 0.5, %v923_v23  ;;  %v856_v39 = vpop.xlane.xlu2 %855  ;;  %v862_v31 = vpop.xlane.xlu1 %861 }
 0x393   :  { %v944_v61 = vmul.f32 0.5, %v943_v63  ;;  %v880_v8 = vmul.f32 %v856_v39, %v2965_v55  ;;  %v882_v27 = vmul.f32 %v862_v31, %v2965_v55 }
 0x394   :  { %v925_v62 = vsub.f32 1.5, %v924_v5 }
 0x395   :  { %v945_v36 = vsub.f32 1.5, %v944_v61  ;;  %v896_v4 = vadd.f32 1e-05, %v880_v8  ;;  %v898_v7 = vadd.f32 1e-05, %v882_v27 }
 0x396   :  { %v926_v6 = vmul.f32 %v1835_v47, %v925_v62  ;;  %1331 = vrot.lane.b32.xlu0 %v1288_v22, %s1886_s20 }
 0x397   :  { %v946_v0 = vmul.f32 %v1837_v30, %v945_v36  ;;  %1838 = vrsqrt.f32 %v896_v4  ;;  %vm1017_vm2 = vweird.f32 %v896_v4  ;;  %vm1037_vm4 = vweird.f32 %v898_v7 }
 0x398   :  { %v930_v17 = vsel %vm929_vm12, %v1835_v47, %v926_v6  ;;  %1840 = vrsqrt.f32 %v898_v7 }
 0x399   :  { %v1063_v46 = vmul.f32 %v930_v17, %v3038_v38  ;;  %v950_v49 = vsel %vm949_vm14, %v1837_v30, %v946_v0 }
 0x39a   :  { %v1065_v20 = vmul.f32 %v950_v49, %v3041_v1  ;;  %v1214_v15 = vpop.xlane.xlu2 %1213 }
 0x39b   :  { %v1082_v56 = vmul.f32 %v3104_v33, %v1063_v46  ;;  %v1250_v45 = vmul.f32 %v1214_v15, %v2965_v55 }
 0x39c   :  { %v1084_v50 = vmul.f32 %v3104_v33, %v1065_v20  ;;  %v841_v58 = vpop.xlane.xlu0 %840 }
 0x39d   :  { %v1839_v19 = vpop.eup %1838  ;;  %v1101_v59 = vadd.f32 %v3110_v3, %v1082_v56  ;;  %v3278_v29 = vsub.f32 %v2933_v35, %v1250_v45  ;;  %v875_v28 = vmul.f32 %v841_v58, %v2965_v55 }
 0x39e   :  { %v1841_v38 = vpop.eup %1840  ;;  %v1103_v53 = vadd.f32 %v3110_v3, %v1084_v50  ;;  %v1012_v1 = vmul.f32 %v1839_v19, %v896_v4  ;;  %v1244_v47 = vpop.xlane.xlu1 %1243  ;;  %vm1018_vm15 = vweird.f32 %v1839_v19 }
 0x39f   :  { %1117 = vst.msk [vmem:[%s3724_s9 + $0x10] sm:$0xff] %vm717_vm1, %v1101_v59  ;;  %v1032_v48 = vmul.f32 %v1841_v38, %v898_v7  ;;  %v891_v30 = vadd.f32 1e-05, %v875_v28  ;;  %v1260_v21 = vmul.f32 %v1244_v47, %v2965_v55  ;;  %v1282_v26 = vmul.f32 %v3278_v29, %v3278_v29  ;;  %vm1019_vm3 = vmor %vm1017_vm2, %vm1018_vm15 }
 0x3a0   :  { %1119 = vst.msk [vmem:[%s3724_s9 + $0x20] sm:$0xff] %vm717_vm1, %v1103_v53  ;;  %v1013_v35 = vmul.f32 %v1839_v19, %v1012_v1  ;;  %vm1038_vm0 = vweird.f32 %v1841_v38 }
 0x3a1   :  { %v1033_v2 = vmul.f32 %v1841_v38, %v1032_v48  ;;  %1842 = vrsqrt.f32 %v891_v30  ;;  %v3294_v37 = vsub.f32 %v2979_v51, %v1260_v21  ;;  %1319 = vrot.lane.b32.xlu0 %v1282_v26, %s1886_s20  ;;  %vm1039_vm5 = vmor %vm1037_vm4, %vm1038_vm0  ;;  %vm967_vm7 = vweird.f32 %v891_v30 }
 0x3a2   :  { %v1014_v23 = vmul.f32 0.5, %v1013_v35  ;;  %v838_v63 = vpop.xlane.xlu2 %837 }
 0x3a3   :  { %v1034_v5 = vmul.f32 0.5, %v1033_v2  ;;  %v874_v39 = vmul.f32 %v838_v63, %v2965_v55  ;;  %v1292_v31 = vmul.f32 %v3294_v37, %v3294_v37 }
 0x3a4   :  { %v1015_v61 = vsub.f32 1.5, %v1014_v23  ;;  %v1220_v8 = vpop.xlane.xlu0 %1219 }
 0x3a5   :  { %v1035_v27 = vsub.f32 1.5, %v1034_v5  ;;  %v890_v62 = vadd.f32 1e-05, %v874_v39  ;;  %v1252_v22 = vmul.f32 %v1220_v8, %v2965_v55  ;;  %1339 = vrot.lane.b32.xlu1 %v1292_v31, %s1886_s20 }
 0x3a6   :  { %v1016_v51 = vmul.f32 %v1839_v19, %v1015_v61 }
 0x3a7   :  { %v1843_v36 = vpop.eup %1842  ;;  %v1036_v6 = vmul.f32 %v1841_v38, %v1035_v27  ;;  %1844 = vrsqrt.f32 %v890_v62  ;;  %v3303_v0 = vsub.f32 %v2963_v43, %v1252_v22  ;;  %vm957_vm10 = vweird.f32 %v890_v62 }
 0x3a8   :  { %v1020_v17 = vsel %vm1019_vm3, %v1839_v19, %v1016_v51  ;;  %v962_v46 = vmul.f32 %v1843_v36, %v891_v30  ;;  %vm968_vm6 = vweird.f32 %v1843_v36 }
 0x3a9   :  { %v1072_v49 = vmul.f32 %v1020_v17, %v3054_v60  ;;  %v1040_v20 = vsel %vm1039_vm5, %v1841_v38, %v1036_v6  ;;  %v1284_v15 = vmul.f32 %v3303_v0, %v3303_v0  ;;  %vm969_vm8 = vmor %vm967_vm7, %vm968_vm6 }
 0x3aa   :  { %v1074_v56 = vmul.f32 %v1040_v20, %v3057_v18  ;;  %v963_v4 = vmul.f32 %v1843_v36, %v962_v46  ;;  %v1241_v45 = vpop.xlane.xlu2 %1240 }
 0x3ab   :  { %v844_v50 = vpop.xlane.xlu1 %843  ;;  %v1091_v7 = vmul.f32 %v3104_v33, %v1072_v49  ;;  %v1259_v58 = vmul.f32 %v1241_v45, %v2965_v55  ;;  %1323 = vrot.lane.b32.xlu2 %v1284_v15, %s1886_s20 }
 0x3ac   :  { %v876_v43 = vmul.f32 %v844_v50, %v2965_v55  ;;  %v1093_v19 = vmul.f32 %v3104_v33, %v1074_v56  ;;  %v964_v60 = vmul.f32 0.5, %v963_v4 }
 0x3ad   :  { %v1845_v59 = vpop.eup %1844  ;;  %v1110_v28 = vadd.f32 %v3110_v3, %v1091_v7  ;;  %v3316_v38 = vsub.f32 %v2954_v42, %v1259_v58 }
 0x3ae   :  { %v892_v18 = vadd.f32 1e-05, %v876_v43  ;;  %v1112_v53 = vadd.f32 %v3110_v3, %v1093_v19  ;;  %v965_v1 = vsub.f32 1.5, %v964_v60  ;;  %v952_v47 = vmul.f32 %v1845_v59, %v890_v62 }
 0x3af   :  { %1126 = vst.msk [vmem:[%s3724_s9 + $0x58] sm:$0xff] %vm717_vm1, %v1110_v28  ;;  %v1291_v48 = vmul.f32 %v3316_v38, %v3316_v38  ;;  %vm958_vm9 = vweird.f32 %v1845_v59 }
 0x3b0   :  { %1846 = vrsqrt.f32 %v892_v18  ;;  %1128 = vst.msk [vmem:[%s3724_s9 + $0x68] sm:$0xff] %vm717_vm1, %v1112_v53  ;;  %v966_v42 = vmul.f32 %v1843_v36, %v965_v1  ;;  %v953_v21 = vmul.f32 %v1845_v59, %v952_v47  ;;  %vm959_vm11 = vmor %vm957_vm10, %vm958_vm9  ;;  %vm977_vm13 = vweird.f32 %v892_v18 }
 0x3b1   :  { %1337 = vrot.lane.b32.xlu0 %v1291_v48, %s1886_s20 }
 0x3b2   :  { %v970_v35 = vsel %vm969_vm8, %v1843_v36, %v966_v42  ;;  %v954_v26 = vmul.f32 0.5, %v953_v21  ;;  %v865_v2 = vpop.xlane.xlu2 %864 }
 0x3b3   :  { %v1067_v23 = vmul.f32 %v970_v35, %v3070_v40  ;;  %v883_v63 = vmul.f32 %v865_v2, %v2965_v55 }
 0x3b4   :  { %v955_v5 = vsub.f32 1.5, %v954_v26 }
 0x3b5   :  { %v1086_v31 = vmul.f32 %v3104_v33, %v1067_v23  ;;  %v899_v61 = vadd.f32 1e-05, %v883_v63 }
 0x3b6   :  { %v1847_v39 = vpop.eup %1846  ;;  %v956_v8 = vmul.f32 %v1845_v59, %v955_v5 }
 0x3b7   :  { %v972_v30 = vmul.f32 %v1847_v39, %v892_v18  ;;  %v1105_v27 = vadd.f32 %v3110_v3, %v1086_v31  ;;  %1848 = vrsqrt.f32 %v899_v61  ;;  %vm978_vm12 = vweird.f32 %v1847_v39 }
 0x3b8   :  { %v960_v22 = vsel %vm959_vm11, %v1845_v59, %v956_v8  ;;  %vm979_vm14 = vmor %vm977_vm13, %vm978_vm12  ;;  %vm1047_vm0 = vweird.f32 %v899_v61 }
 0x3b9   :  { %v973_v51 = vmul.f32 %v1847_v39, %v972_v30  ;;  %1121 = vst.msk [vmem:[%s3724_s9 + $0x30] sm:$0xff] %vm717_vm1, %v1105_v27  ;;  %v1066_v40 = vmul.f32 %v960_v22, %v3073_v14 }
 0x3ba   :  { %v1312_v59 = vpop.permute.xlu2 %1311 }
 0x3bb   :  { %v974_v36 = vmul.f32 0.5, %v973_v51  ;;  %v1085_v6 = vmul.f32 %v3104_v33, %v1066_v40  ;;  %v1360_v28 = vsel %vm717_vm1, %v1312_v59, 0.0 }
 0x3bd   :  { %v975_v17 = vsub.f32 1.5, %v974_v36  ;;  %v1849_v62 = vpop.eup %1848  ;;  %v1104_v46 = vadd.f32 %v3110_v3, %v1085_v6 }
 0x3be   :  { %v1042_v20 = vmul.f32 %v1849_v62, %v899_v61  ;;  %vm1048_vm15 = vweird.f32 %v1849_v62 }
 0x3bf   :  { %v976_v49 = vmul.f32 %v1847_v39, %v975_v17  ;;  %1120 = vst.msk [vmem:[%s3724_s9 + $0x28] sm:$0xff] %vm717_vm1, %v1104_v46  ;;  %vm1049_vm2 = vmor %vm1047_vm0, %vm1048_vm15 }
 0x3c0   :  { %v1043_v56 = vmul.f32 %v1849_v62, %v1042_v20 }
 0x3c1   :  { %v980_v15 = vsel %vm979_vm14, %v1847_v39, %v976_v49 }
 0x3c2   :  { %v1068_v14 = vmul.f32 %v980_v15, %v3087_v44  ;;  %v1044_v4 = vmul.f32 0.5, %v1043_v56  ;;  %v1330_v18 = vpop.permute.xlu2 %1329 }
 0x3c4   :  { %v1087_v45 = vmul.f32 %v3104_v33, %v1068_v14  ;;  %v1045_v50 = vsub.f32 1.5, %v1044_v4 }
 0x3c6   :  { %v1106_v7 = vadd.f32 %v3110_v3, %v1087_v45  ;;  %v1046_v58 = vmul.f32 %v1849_v62, %v1045_v50 }
 0x3c8   :  { %1122 = vst.msk [vmem:[%s3724_s9 + $0x38] sm:$0xff] %vm717_vm1, %v1106_v7  ;;  %v1050_v43 = vsel %vm1049_vm2, %v1849_v62, %v1046_v58 }
 0x3c9   :  { %v1075_v19 = vmul.f32 %v1050_v43, %v3092_v25  ;;  %v1387_v25 = vsel %vm717_vm1, %v1330_v18, 0.0 }
 0x3ca   :  { %v1318_v48 = vpop.permute.xlu2 %1317 }
 0x3cb   :  { %v1094_v44 = vmul.f32 %v3104_v33, %v1075_v19  ;;  %v1369_v35 = vsel %vm717_vm1, %v1318_v48, 0.0 }
 0x3cd   :  { %v1113_v60 = vadd.f32 %v3110_v3, %v1094_v44 }
 0x3cf   :  { %1129 = vst.msk [vmem:[%s3724_s9 + $0x70] sm:$0xff] %vm717_vm1, %v1113_v60 }
 0x3d2   :  { %v1336_v23 = vpop.permute.xlu2 %1335 }
 0x3d3   :  { %v1328_v61 = vpop.permute.xlu1 %1327  ;;  %v1396_v8 = vsel %vm717_vm1, %v1336_v23, 0.0 }
 0x3d4   :  { %v1384_v36 = vsel %vm717_vm1, %v1328_v61, 0.0 }
 0x3db   :  { %1361 = vadd.xlane.f32.xlu0 %v1360_v28 }
 0x3dd   :  { %v868_v53 = vpop.xlane.xlu0 %867 }
 0x3de   :  { %v884_v1 = vmul.f32 %v868_v53, %v2965_v55 }
 0x3e0   :  { %v900_v47 = vadd.f32 1e-05, %v884_v1 }
 0x3e2   :  { %1850 = vrsqrt.f32 %v900_v47  ;;  %vm1057_vm4 = vweird.f32 %v900_v47 }
 0x3e3   :  { %1388 = vadd.xlane.f32.xlu0 %v1387_v25 }
 0x3e8   :  { %v1851_v42 = vpop.eup %1850 }
 0x3e9   :  { %v1052_v21 = vmul.f32 %v1851_v42, %v900_v47  ;;  %vm1058_vm3 = vweird.f32 %v1851_v42 }
 0x3ea   :  { %vm1059_vm5 = vmor %vm1057_vm4, %vm1058_vm3 }
 0x3eb   :  { %v1053_v26 = vmul.f32 %v1851_v42, %v1052_v21  ;;  %1370 = vadd.xlane.f32.xlu0 %v1369_v35 }
 0x3ed   :  { %v1054_v2 = vmul.f32 0.5, %v1053_v26 }
 0x3ef   :  { %v1055_v63 = vsub.f32 1.5, %v1054_v2 }
 0x3f0   :  { %v1310_v5 = vpop.permute.xlu0 %1309 }
 0x3f1   :  { %v1056_v39 = vmul.f32 %v1851_v42, %v1055_v63  ;;  %v1357_v31 = vsel %vm717_vm1, %v1310_v5, 0.0 }
 0x3f2   :  { %1358 = vadd.xlane.f32.xlu2 %v1357_v31 }
 0x3f3   :  { %v1060_v30 = vsel %vm1059_vm5, %v1851_v42, %v1056_v39  ;;  %1397 = vadd.xlane.f32.xlu0 %v1396_v8  ;;  %v1314_v17 = vpop.permute.xlu1 %1313 }
 0x3f4   :  { %v1076_v27 = vmul.f32 %v1060_v30, %v3158_v16  ;;  %v1363_v16 = vsel %vm717_vm1, %v1314_v17, 0.0  ;;  %v3796_v17 = vld [vmem:[#allocation15_spill] sm:$0xff] }
 0x3f6   :  { %v1095_v22 = vmul.f32 %v3104_v33, %v1076_v27  ;;  %v3795_v27 = vld [vmem:[#allocation16_spill] sm:$0xff] }
 0x3f8   :  { %v1114_v51 = vadd.f32 %v3110_v3, %v1095_v22  ;;  %v1326_v40 = vpop.permute.xlu0 %1325 }
 0x3f9   :  { %v1381_v6 = vsel %vm717_vm1, %v1326_v40, 0.0 }
 0x3fa   :  { %1130 = vst.msk [vmem:[%s3724_s9 + $0x78] sm:$0xff] %vm717_vm1, %v1114_v51  ;;  %1385 = vadd.xlane.f32.xlu2 %v1384_v36  ;;  %1382 = vadd.xlane.f32.xlu1 %v1381_v6 }
 0x3fb   :  { %v1334_v3 = vpop.permute.xlu1 %1333 }
 0x3fc   :  { %v1393_v15 = vsel %vm717_vm1, %v1334_v3, 0.0 }
 0x400   :  { %v1316_v62 = vpop.permute.xlu0 %1315 }
 0x401   :  { %v1366_v33 = vsel %vm717_vm1, %v1316_v62, 0.0 }
 0x402   :  { %1364 = vadd.xlane.f32.xlu1 %v1363_v16  ;;  %1367 = vadd.xlane.f32.xlu2 %v1366_v33 }
 0x403   :  { %v1322_v14 = vpop.permute.xlu1 %1321 }
 0x404   :  { %v1375_v4 = vsel %vm717_vm1, %v1322_v14, 0.0 }
 0x405   :  { %v1324_v46 = vpop.permute.xlu2 %1323 }
 0x406   :  { %v1378_v49 = vsel %vm717_vm1, %v1324_v46, 0.0 }
 0x407   :  { %1379 = vadd.xlane.f32.xlu0 %v1378_v49 }
 0x408   :  { %v1332_v20 = vpop.permute.xlu0 %1331 }
 0x409   :  { %v1390_v56 = vsel %vm717_vm1, %v1332_v20, 0.0 }
 0x40a   :  { %1394 = vadd.xlane.f32.xlu2 %v1393_v15  ;;  %1391 = vadd.xlane.f32.xlu1 %v1390_v56 }
 0x412   :  { %1376 = vadd.xlane.f32.xlu2 %v1375_v4 }
 0x413   :  { %v1320_v45 = vpop.permute.xlu0 %1319 }
 0x414   :  { %v1372_v50 = vsel %vm717_vm1, %v1320_v45, 0.0 }
 0x415   :  { %1373 = vadd.xlane.f32.xlu1 %v1372_v50 }
 0x417   :  { %v1340_v7 = vpop.permute.xlu1 %1339 }
 0x418   :  { %v1402_v58 = vsel %vm717_vm1, %v1340_v7, 0.0 }
 0x41a   :  { %1403 = vadd.xlane.f32.xlu2 %v1402_v58 }
 0x423   :  { %v1338_v43 = vpop.permute.xlu0 %1337 }
 0x424   :  { %v1399_v19 = vsel %vm717_vm1, %v1338_v43, 0.0 }
 0x425   :  { %1400 = vadd.xlane.f32.xlu1 %v1399_v19 }
 0x44e   :  { %v1362_v44 = vpop.xlane.xlu0 %1361 }
 0x44f   :  { %v1406_v60 = vmul.f32 %v1362_v44, %v2965_v55 }
 0x451   :  { %v1422_v59 = vadd.f32 1e-05, %v1406_v60 }
 0x453   :  { %1852 = vrsqrt.f32 %v1422_v59  ;;  %vm1453_vm7 = vweird.f32 %v1422_v59 }
 0x456   :  { %v1389_v28 = vpop.xlane.xlu0 %1388 }
 0x457   :  { %v1415_v18 = vmul.f32 %v1389_v28, %v2965_v55 }
 0x459   :  { %v1853_v53 = vpop.eup %1852  ;;  %v1431_v1 = vadd.f32 1e-05, %v1415_v18 }
 0x45a   :  { %v1448_v47 = vmul.f32 %v1853_v53, %v1422_v59  ;;  %vm1454_vm6 = vweird.f32 %v1853_v53 }
 0x45b   :  { %1854 = vrsqrt.f32 %v1431_v1  ;;  %vm1455_vm8 = vmor %vm1453_vm7, %vm1454_vm6  ;;  %vm1543_vm10 = vweird.f32 %v1431_v1 }
 0x45c   :  { %v1449_v25 = vmul.f32 %v1853_v53, %v1448_v47 }
 0x45e   :  { %v1450_v48 = vmul.f32 0.5, %v1449_v25  ;;  %v1371_v42 = vpop.xlane.xlu0 %1370 }
 0x45f   :  { %v1409_v21 = vmul.f32 %v1371_v42, %v2965_v55 }
 0x460   :  { %v1451_v35 = vsub.f32 1.5, %v1450_v48 }
 0x461   :  { %v1855_v26 = vpop.eup %1854  ;;  %v3386_v2 = vadd.f32 1e-05, %v1409_v21 }
 0x462   :  { %v1452_v23 = vmul.f32 %v1853_v53, %v1451_v35  ;;  %v1538_v63 = vmul.f32 %v1855_v26, %v1431_v1  ;;  %vm1544_vm9 = vweird.f32 %v1855_v26 }
 0x463   :  { %1856 = vrsqrt.f32 %v3386_v2  ;;  %vm3411_vm11 = vmor %vm1543_vm10, %vm1544_vm9  ;;  %vm1483_vm0 = vweird.f32 %v3386_v2 }
 0x464   :  { %v1456_v5 = vsel %vm1455_vm8, %v1853_v53, %v1452_v23  ;;  %v1539_v39 = vmul.f32 %v1855_v26, %v1538_v63 }
 0x465   :  { %v1359_v31 = vpop.xlane.xlu2 %1358  ;;  %v1598_v61 = vmul.f32 %v1456_v5, %v3115_v34 }
 0x466   :  { %v1405_v8 = vmul.f32 %v1359_v31, %v2965_v55  ;;  %v1398_v30 = vpop.xlane.xlu0 %1397  ;;  %v1540_v6 = vmul.f32 0.5, %v1539_v39 }
 0x467   :  { %v1619_v22 = vmul.f32 %v3795_v27, %v1598_v61  ;;  %v1418_v40 = vmul.f32 %v1398_v30, %v2965_v55 }
 0x468   :  { %v1421_v51 = vadd.f32 1e-05, %v1405_v8  ;;  %v1541_v33 = vsub.f32 1.5, %v1540_v6 }
 0x469   :  { %v3393_v36 = vpop.eup %1856  ;;  %v1640_v62 = vadd.f32 %v3796_v17, %v1619_v22  ;;  %v3399_v34 = vadd.f32 1e-05, %v1418_v40 }
 0x46a   :  { %v1478_v16 = vmul.f32 %v3393_v36, %v3386_v2  ;;  %1858 = vrsqrt.f32 %v1421_v51  ;;  %v1542_v45 = vmul.f32 %v1855_v26, %v1541_v33  ;;  %vm1484_vm12 = vweird.f32 %v3393_v36 }
 0x46b   :  { %1673 = vrot.lane.b32.xlu0 %v1640_v62, %s1886_s20  ;;  %1860 = vrsqrt.f32 %v3399_v34  ;;  %vm1443_vm14 = vweird.f32 %v1421_v51  ;;  %vm3447_vm2 = vmor %vm1483_vm0, %vm1484_vm12 }
 0x46c   :  { %v1479_v3 = vmul.f32 %v3393_v36, %v1478_v16  ;;  %v1546_v19 = vsel %vm3411_vm11, %v1855_v26, %v1542_v45 }
 0x46d   :  { %v1386_v46 = vpop.xlane.xlu2 %1385  ;;  %v1383_v49 = vpop.xlane.xlu1 %1382  ;;  %v1607_v21 = vmul.f32 %v1546_v19, %v3130_v54 }
 0x46e   :  { %v1414_v20 = vmul.f32 %v1386_v46, %v2965_v55  ;;  %v1413_v15 = vmul.f32 %v1383_v49, %v2965_v55  ;;  %v1480_v50 = vmul.f32 0.5, %v1479_v3 }
 0x46f   :  { %v1628_v2 = vmul.f32 %v3795_v27, %v1607_v21 }
 0x470   :  { %v1859_v56 = vpop.eup %1858  ;;  %v3405_v14 = vadd.f32 1e-05, %v1414_v20  ;;  %v3407_v4 = vadd.f32 1e-05, %v1413_v15  ;;  %v1481_v44 = vsub.f32 1.5, %v1480_v50 }
 0x471   :  { %v1438_v7 = vmul.f32 %v1859_v56, %v1421_v51  ;;  %v3417_v18 = vpop.eup %1860  ;;  %vm1444_vm13 = vweird.f32 %v1859_v56  ;;  %v1649_v21 = vadd.f32 %v3796_v17, %v1628_v2 }
 0x472   :  { %1862 = vrsqrt.f32 %v3405_v14  ;;  %v1482_v26 = vmul.f32 %v3393_v36, %v1481_v44  ;;  %v1568_v63 = vmul.f32 %v3417_v18, %v3399_v34  ;;  %vm3434_vm15 = vmor %vm1443_vm14, %vm1444_vm13  ;;  %vm1533_vm3 = vweird.f32 %v3405_v14 }
 0x473   :  { %v1439_v58 = vmul.f32 %v1859_v56, %v1438_v7  ;;  %1864 = vrsqrt.f32 %v3407_v4  ;;  %vm1523_vm5 = vweird.f32 %v3407_v4 }
 0x474   :  { %v1486_v40 = vsel %vm3447_vm2, %v3393_v36, %v1482_v26  ;;  %v1569_v6 = vmul.f32 %v3417_v18, %v1568_v63  ;;  %vm1574_vm2 = vweird.f32 %v3417_v18 }
 0x475   :  { %v1440_v60 = vmul.f32 0.5, %v1439_v58  ;;  %v1365_v59 = vpop.xlane.xlu1 %1364  ;;  %v1368_v28 = vpop.xlane.xlu2 %1367  ;;  %v1601_v44 = vmul.f32 %v1486_v40, %v3147_v32 }
 0x476   :  { %v1407_v53 = vmul.f32 %v1365_v59, %v2965_v55  ;;  %v1408_v1 = vmul.f32 %v1368_v28, %v2965_v55 }
 0x477   :  { %v1441_v47 = vsub.f32 1.5, %v1440_v60  ;;  %v3479_v60 = vmul.f32 0.5, %v1569_v6 }
 0x478   :  { %v3422_v25 = vpop.eup %1862  ;;  %v3424_v48 = vadd.f32 1e-05, %v1407_v53  ;;  %v3426_v42 = vadd.f32 1e-05, %v1408_v1 }
 0x479   :  { %v1865_v35 = vpop.eup %1864  ;;  %v1442_v23 = vmul.f32 %v1859_v56, %v1441_v47  ;;  %v1528_v5 = vmul.f32 %v3422_v25, %v3405_v14  ;;  %vm1534_vm4 = vweird.f32 %v3422_v25  ;;  %v1571_v39 = vsub.f32 1.5, %v3479_v60 }
 0x47a   :  { %v1518_v31 = vmul.f32 %v1865_v35, %v3407_v4  ;;  %1866 = vrsqrt.f32 %v3424_v48  ;;  %v1380_v61 = vpop.xlane.xlu0 %1379  ;;  %vm1524_vm6 = vweird.f32 %v1865_v35  ;;  %vm1535_vm7 = vmor %vm1533_vm3, %vm1534_vm4  ;;  %v3498_v4 = vmul.f32 %v3795_v27, %v1601_v44 }
 0x47b   :  { %v1446_v54 = vsel %vm3434_vm15, %v1859_v56, %v1442_v23  ;;  %v1529_v8 = vmul.f32 %v3422_v25, %v1528_v5  ;;  %1868 = vrsqrt.f32 %v3426_v42  ;;  %v1412_v51 = vmul.f32 %v1380_v61, %v2965_v55  ;;  %vm1525_vm8 = vmor %vm1523_vm5, %vm1524_vm6 }
 0x47c   :  { %v1519_v22 = vmul.f32 %v1865_v35, %v1518_v31  ;;  %v1597_v3 = vmul.f32 %v1446_v54, %v3188_v11  ;;  %vm1463_vm9 = vweird.f32 %v3424_v48  ;;  %vm1473_vm11 = vweird.f32 %v3426_v42 }
 0x47d   :  { %v1530_v62 = vmul.f32 0.5, %v1529_v8  ;;  %v1395_v16 = vpop.xlane.xlu2 %1394  ;;  %v1392_v33 = vpop.xlane.xlu1 %1391  ;;  %v3459_v49 = vadd.f32 1e-05, %v1412_v51 }
 0x47e   :  { %v1520_v46 = vmul.f32 0.5, %v1519_v22  ;;  %v1417_v20 = vmul.f32 %v1395_v16, %v2965_v55  ;;  %v1416_v15 = vmul.f32 %v1392_v33, %v2965_v55  ;;  %v1618_v11 = vmul.f32 %v3795_v27, %v1597_v3 }
 0x47f   :  { %v1531_v56 = vsub.f32 1.5, %v1530_v62  ;;  %1870 = vrsqrt.f32 %v3459_v49  ;;  %vm1513_vm14 = vweird.f32 %v3459_v49 }
 0x480   :  { %v3465_v36 = vpop.eup %1866  ;;  %v1521_v45 = vsub.f32 1.5, %v1520_v46  ;;  %v3468_v50 = vadd.f32 1e-05, %v1417_v20  ;;  %v3476_v19 = vadd.f32 1e-05, %v1416_v15  ;;  %v1639_v47 = vadd.f32 %v3796_v17, %v1618_v11 }
 0x481   :  { %v3471_v7 = vpop.eup %1868  ;;  %v1532_v58 = vmul.f32 %v3422_v25, %v1531_v56  ;;  %v1458_v43 = vmul.f32 %v3465_v36, %v3424_v48  ;;  %vm1464_vm10 = vweird.f32 %v3465_v36 }
 0x482   :  { %v1522_v59 = vmul.f32 %v1865_v35, %v1521_v45  ;;  %v1468_v28 = vmul.f32 %v3471_v7, %v3426_v42  ;;  %1872 = vrsqrt.f32 %v3468_v50  ;;  %1671 = vrot.lane.b32.xlu2 %v1639_v47, %s1886_s20  ;;  %vm1474_vm12 = vweird.f32 %v3471_v7  ;;  %vm3525_vm13 = vmor %vm1463_vm9, %vm1464_vm10 }
 0x483   :  { %v1536_v53 = vsel %vm1535_vm7, %v3422_v25, %v1532_v58  ;;  %v1459_v1 = vmul.f32 %v3465_v36, %v1458_v43  ;;  %1874 = vrsqrt.f32 %v3476_v19  ;;  %vm3541_vm15 = vmor %vm1473_vm11, %vm1474_vm12  ;;  %vm1563_vm6 = vweird.f32 %v3468_v50 }
 0x484   :  { %v1526_v32 = vsel %vm1525_vm8, %v1865_v35, %v1522_v59  ;;  %v1469_v14 = vmul.f32 %v3471_v7, %v1468_v28  ;;  %v1606_v25 = vmul.f32 %v1536_v53, %v3134_v13  ;;  %vm1553_vm8 = vweird.f32 %v3476_v19 }
 0x485   :  { %v1460_v26 = vmul.f32 0.5, %v1459_v1  ;;  %v1377_v23 = vpop.xlane.xlu2 %1376  ;;  %v1605_v63 = vmul.f32 %v1526_v32, %v3212_v41  ;;  %v3500_v5 = vpop.eup %1870  ;;  %vm1573_vm10 = vweird.f32 %v3399_v34 }
 0x486   :  { %v1470_v35 = vmul.f32 0.5, %v1469_v14  ;;  %v1411_v31 = vmul.f32 %v1377_v23, %v2965_v55  ;;  %v1508_v13 = vmul.f32 %v3500_v5, %v3459_v49  ;;  %v1627_v62 = vmul.f32 %v3795_v27, %v1606_v25  ;;  %vm3607_vm12 = vmor %vm1573_vm10, %vm1574_vm2 }
 0x487   :  { %v1461_v61 = vsub.f32 1.5, %v1460_v26  ;;  %v1626_v30 = vmul.f32 %v3795_v27, %v1605_v63  ;;  %vm1514_vm0 = vweird.f32 %v3500_v5 }
 0x488   :  { %v3510_v41 = vpop.eup %1872  ;;  %v1471_v54 = vsub.f32 1.5, %v1470_v35  ;;  %v3513_v8 = vadd.f32 1e-05, %v1411_v31  ;;  %v1509_v2 = vmul.f32 %v3500_v5, %v1508_v13  ;;  %v1374_v6 = vpop.xlane.xlu1 %1373  ;;  %v1648_v43 = vadd.f32 %v3796_v17, %v1627_v62  ;;  %vm3570_vm4 = vmor %vm1513_vm14, %vm1514_vm0 }
 0x489   :  { %v3516_v22 = vpop.eup %1874  ;;  %v1462_v51 = vmul.f32 %v3465_v36, %v1461_v61  ;;  %v1558_v40 = vmul.f32 %v3510_v41, %v3468_v50  ;;  %v1410_v45 = vmul.f32 %v1374_v6, %v2965_v55  ;;  %v1647_v42 = vadd.f32 %v3796_v17, %v1626_v30 }
 0x48a   :  { %v1472_v33 = vmul.f32 %v3471_v7, %v1471_v54  ;;  %v1548_v3 = vmul.f32 %v3516_v22, %v3476_v19  ;;  %1876 = vrsqrt.f32 %v3513_v8  ;;  %v1510_v20 = vmul.f32 0.5, %v1509_v2  ;;  %1691 = vrot.lane.b32.xlu2 %v1649_v21, %s1886_s20  ;;  %1689 = vrot.lane.b32.xlu0 %v1648_v43, %s1886_s20 }
 0x48b   :  { %v1466_v46 = vsel %vm3525_vm13, %v3465_v36, %v1462_v51  ;;  %v1559_v15 = vmul.f32 %v3510_v41, %v1558_v40  ;;  %vm1564_vm3 = vweird.f32 %v3510_v41  ;;  %v3557_v53 = vadd.f32 1e-05, %v1410_v45  ;;  %1687 = vrot.lane.b32.xlu1 %v1647_v42, %s1886_s20 }
 0x48c   :  { %v1476_v56 = vsel %vm3541_vm15, %v3471_v7, %v1472_v33  ;;  %v1549_v36 = vmul.f32 %v3516_v22, %v1548_v3  ;;  %v1511_v11 = vsub.f32 1.5, %v1510_v20  ;;  %v1599_v59 = vmul.f32 %v1466_v46, %v3199_v10  ;;  %vm1565_vm7 = vmor %vm1563_vm6, %vm1564_vm3 }
 0x48d   :  { %v1560_v58 = vmul.f32 0.5, %v1559_v15  ;;  %v1404_v44 = vpop.xlane.xlu2 %1403  ;;  %v1600_v10 = vmul.f32 %v1476_v56, %v3235_v57  ;;  %vm1554_vm5 = vweird.f32 %v3516_v22  ;;  %1878 = vrsqrt.f32 %v3557_v53 }
 0x48e   :  { %v1550_v28 = vmul.f32 0.5, %v1549_v36  ;;  %v1420_v7 = vmul.f32 %v1404_v44, %v2965_v55  ;;  %v1512_v1 = vmul.f32 %v3500_v5, %v1511_v11  ;;  %v1620_v14 = vmul.f32 %v3795_v27, %v1599_v59  ;;  %vm1555_vm9 = vmor %vm1553_vm8, %vm1554_vm5 }
 0x48f   :  { %v1561_v32 = vsub.f32 1.5, %v1560_v58  ;;  %v1621_v61 = vmul.f32 %v3795_v27, %v1600_v10  ;;  %v1643_v50 = vadd.f32 %v3796_v17, %v3498_v4  ;;  %v1572_v13 = vmul.f32 %v3417_v18, %v1571_v39 }
 0x490   :  { %v1877_v47 = vpop.eup %1876  ;;  %v1551_v21 = vsub.f32 1.5, %v1550_v28  ;;  %v3576_v23 = vadd.f32 1e-05, %v1420_v7  ;;  %v1516_v57 = vsel %vm3570_vm4, %v3500_v5, %v1512_v1  ;;  %v1641_v35 = vadd.f32 %v3796_v17, %v1620_v14 }
 0x491   :  { %v1562_v63 = vmul.f32 %v3510_v41, %v1561_v32  ;;  %v1498_v49 = vmul.f32 %v1877_v47, %v3513_v8  ;;  %v1604_v30 = vmul.f32 %v1516_v57, %v3303_v0  ;;  %vm1504_vm11 = vweird.f32 %v1877_v47 }
 0x492   :  { %v1552_v25 = vmul.f32 %v3516_v22, %v1551_v21  ;;  %1880 = vrsqrt.f32 %v3576_v23  ;;  %1679 = vrot.lane.b32.xlu2 %v1643_v50, %s1886_s20  ;;  %v1576_v39 = vsel %vm3607_vm12, %v3417_v18, %v1572_v13  ;;  %vm1503_vm13 = vweird.f32 %v3513_v8 }
 0x493   :  { %v1566_v31 = vsel %vm1565_vm7, %v3510_v41, %v1562_v63  ;;  %v1499_v5 = vmul.f32 %v1877_v47, %v1498_v49  ;;  %v1642_v41 = vadd.f32 %v3796_v17, %v1621_v61  ;;  %v1879_v40 = vpop.eup %1878  ;;  %1675 = vrot.lane.b32.xlu1 %v1641_v35, %s1886_s20  ;;  %v1625_v6 = vmul.f32 %v3795_v27, %v1604_v30  ;;  %vm1505_vm14 = vmor %vm1503_vm13, %vm1504_vm11 }
 0x494   :  { %v1556_v54 = vsel %vm1555_vm9, %v3516_v22, %v1552_v25  ;;  %v1609_v19 = vmul.f32 %v1566_v31, %v3218_v52  ;;  %v1488_v0 = vmul.f32 %v1879_v40, %v3557_v53  ;;  %v1610_v8 = vmul.f32 %v1576_v39, %v3172_v12 }
 0x495   :  { %v1500_v51 = vmul.f32 0.5, %v1499_v5  ;;  %v1608_v2 = vmul.f32 %v1556_v54, %v3263_v24  ;;  %1677 = vrot.lane.b32.xlu0 %v1642_v41, %s1886_s20  ;;  %v1646_v36 = vadd.f32 %v3796_v17, %v1625_v6  ;;  %vm1494_vm15 = vweird.f32 %v1879_v40 }
 0x496   :  { %v1630_v34 = vmul.f32 %v3795_v27, %v1609_v19  ;;  %v1489_v16 = vmul.f32 %v1879_v40, %v1488_v0  ;;  %vm1493_vm0 = vweird.f32 %v3557_v53  ;;  %v1631_v12 = vmul.f32 %v3795_v27, %v1610_v8 }
 0x497   :  { %v1501_v52 = vsub.f32 1.5, %v1500_v51  ;;  %v1629_v24 = vmul.f32 %v3795_v27, %v1608_v2  ;;  %vm1495_vm3 = vmor %vm1493_vm0, %vm1494_vm15  ;;  %vm1593_vm4 = vweird.f32 %v3576_v23 }
 0x498   :  { %v1881_v4 = vpop.eup %1880  ;;  %v1401_v22 = vpop.xlane.xlu1 %1400  ;;  %v1490_v20 = vmul.f32 0.5, %v1489_v16  ;;  %v1651_v18 = vadd.f32 %v3796_v17, %v1630_v34  ;;  %v1652_v32 = vadd.f32 %v3796_v17, %v1631_v12 }
 0x499   :  { %v1502_v62 = vmul.f32 %v1877_v47, %v1501_v52  ;;  %v1588_v33 = vmul.f32 %v1881_v4, %v3576_v23  ;;  %v1419_v3 = vmul.f32 %v1401_v22, %v2965_v55  ;;  %v1650_v46 = vadd.f32 %v3796_v17, %v1629_v24 }
 0x49a   :  { %v1491_v42 = vsub.f32 1.5, %v1490_v20  ;;  %1685 = vrot.lane.b32.xlu2 %v1646_v36, %s1886_s20  ;;  %vm1594_vm2 = vweird.f32 %v1881_v4 }
 0x49b   :  { %v1506_v48 = vsel %vm1505_vm14, %v1877_v47, %v1502_v62  ;;  %v1589_v15 = vmul.f32 %v1881_v4, %v1588_v33  ;;  %v1435_v56 = vadd.f32 1e-05, %v1419_v3  ;;  %1693 = vrot.lane.b32.xlu1 %v1650_v46, %s1886_s20  ;;  %vm1595_vm5 = vmor %vm1593_vm4, %vm1594_vm2 }
 0x49c   :  { %v1603_v45 = vmul.f32 %v1506_v48, %v3248_v9  ;;  %v1492_v55 = vmul.f32 %v1879_v40, %v1491_v42 }
 0x49d   :  { %v1590_v11 = vmul.f32 0.5, %v1589_v15  ;;  %1882 = vrsqrt.f32 %v1435_v56  ;;  %1695 = vrot.lane.b32.xlu0 %v1651_v18, %s1886_s20  ;;  %vm1583_vm7 = vweird.f32 %v1435_v56 }
 0x49e   :  { %v1624_v43 = vmul.f32 %v3795_v27, %v1603_v45  ;;  %v1496_v9 = vsel %vm1495_vm3, %v1879_v40, %v1492_v55 }
 0x49f   :  { %v1591_v58 = vsub.f32 1.5, %v1590_v11  ;;  %v1602_v59 = vmul.f32 %v1496_v9, %v3278_v29 }
 0x4a0   :  { %v1645_v53 = vadd.f32 %v3796_v17, %v1624_v43 }
 0x4a1   :  { %v1592_v44 = vmul.f32 %v1881_v4, %v1591_v58  ;;  %v1623_v14 = vmul.f32 %v3795_v27, %v1602_v59 }
 0x4a2   :  { %1697 = vrot.lane.b32.xlu2 %v1652_v32, %s1886_s20 }
 0x4a3   :  { %v1596_v28 = vsel %vm1595_vm5, %v1881_v4, %v1592_v44  ;;  %v1883_v7 = vpop.eup %1882  ;;  %v1644_v47 = vadd.f32 %v3796_v17, %v1623_v14 }
 0x4a4   :  { %v1612_v1 = vmul.f32 %v1596_v28, %v3294_v37  ;;  %v1578_v10 = vmul.f32 %v1883_v7, %v1435_v56  ;;  %vm1584_vm6 = vweird.f32 %v1883_v7 }
 0x4a5   :  { %1683 = vrot.lane.b32.xlu0 %v1645_v53, %s1886_s20  ;;  %1681 = vrot.lane.b32.xlu1 %v1644_v47, %s1886_s20  ;;  %vm1585_vm8 = vmor %vm1583_vm7, %vm1584_vm6 }
 0x4a6   :  { %v1579_v26 = vmul.f32 %v1883_v7, %v1578_v10  ;;  %v1633_v29 = vmul.f32 %v3795_v27, %v1612_v1 }
 0x4a8   :  { %v1580_v21 = vmul.f32 0.5, %v1579_v26  ;;  %v1654_v37 = vadd.f32 %v3796_v17, %v1633_v29 }
 0x4aa   :  { %v1581_v23 = vsub.f32 1.5, %v1580_v21 }
 0x4ac   :  { %v1582_v57 = vmul.f32 %v1883_v7, %v1581_v23 }
 0x4ad   :  { %1701 = vrot.lane.b32.xlu0 %v1654_v37, %s1886_s20 }
 0x4ae   :  { %v1586_v63 = vsel %vm1585_vm8, %v1883_v7, %v1582_v57 }
 0x4af   :  { %v1611_v49 = vmul.f32 %v1586_v63, %v3316_v38 }
 0x4b1   :  { %v1632_v25 = vmul.f32 %v3795_v27, %v1611_v49 }
 0x4b3   :  { %v1653_v35 = vadd.f32 %v3796_v17, %v1632_v25 }
 0x4b5   :  { %1699 = vrot.lane.b32.xlu1 %v1653_v35, %s1886_s20 }
 0x4dc   :  { %v1672_v5 = vpop.permute.xlu2 %1671 }
 0x4dd   :  { %v1674_v31 = vpop.permute.xlu0 %1673  ;;  %1719 = vst.msk [vmem:[%s3725_s10] sm:$0xff] %vm717_vm1, %v1672_v5 }
 0x4de   :  { %1720 = vst.msk [vmem:[%s3725_s10 + $0x8] sm:$0xff] %vm717_vm1, %v1674_v31 }
 0x4e4   :  { %v1692_v61 = vpop.permute.xlu2 %1691 }
 0x4e5   :  { %1729 = vst.msk [vmem:[%s3725_s10 + $0x50] sm:$0xff] %vm717_vm1, %v1692_v61 }
 0x4ec   :  { %v1680_v38 = vpop.permute.xlu2 %1679 }
 0x4ed   :  { %1723 = vst.msk [vmem:[%s3725_s10 + $0x20] sm:$0xff] %vm717_vm1, %v1680_v38 }
 0x4f4   :  { %v1686_v27 = vpop.permute.xlu2 %1685 }
 0x4f5   :  { %1726 = vst.msk [vmem:[%s3725_s10 + $0x38] sm:$0xff] %vm717_vm1, %v1686_v27 }
 0x4fc   :  { %v1698_v50 = vpop.permute.xlu2 %1697  ;;  %v1690_v13 = vpop.permute.xlu0 %1689 }
 0x4fd   :  { %v1688_v17 = vpop.permute.xlu1 %1687  ;;  %1732 = vst.msk [vmem:[%s3725_s10 + $0x68] sm:$0xff] %vm717_vm1, %v1698_v50 }
 0x4fe   :  { %1727 = vst.msk [vmem:[%s3725_s10 + $0x40] sm:$0xff] %vm717_vm1, %v1688_v17 }
 0x4ff   :  { %1728 = vst.msk [vmem:[%s3725_s10 + $0x48] sm:$0xff] %vm717_vm1, %v1690_v13 }
 0x505   :  { %v1676_v54 = vpop.permute.xlu1 %1675 }
 0x506   :  { %1721 = vst.msk [vmem:[%s3725_s10 + $0x10] sm:$0xff] %vm717_vm1, %v1676_v54 }
 0x507   :  { %v1678_v19 = vpop.permute.xlu0 %1677 }
 0x508   :  { %1722 = vst.msk [vmem:[%s3725_s10 + $0x18] sm:$0xff] %vm717_vm1, %v1678_v19 }
 0x50d   :  { %v1694_v30 = vpop.permute.xlu1 %1693 }
 0x50e   :  { %1730 = vst.msk [vmem:[%s3725_s10 + $0x58] sm:$0xff] %vm717_vm1, %v1694_v30 }
 0x50f   :  { %v1696_v51 = vpop.permute.xlu0 %1695 }
 0x510   :  { %1731 = vst.msk [vmem:[%s3725_s10 + $0x60] sm:$0xff] %vm717_vm1, %v1696_v51 }
 0x517   :  { %v1684_v41 = vpop.permute.xlu0 %1683  ;;  %v1682_v2 = vpop.permute.xlu1 %1681 }
 0x518   :  { %1725 = vst.msk [vmem:[%s3725_s10 + $0x30] sm:$0xff] %vm717_vm1, %v1684_v41 }
 0x519   :  { %1724 = vst.msk [vmem:[%s3725_s10 + $0x28] sm:$0xff] %vm717_vm1, %v1682_v2 }
 0x51f   :  { %v1702_v40 = vpop.permute.xlu0 %1701 }
 0x520   :  { %1734 = vst.msk [vmem:[%s3725_s10 + $0x78] sm:$0xff] %vm717_vm1, %v1702_v40 }
 0x527   :  { %v1700_v60 = vpop.permute.xlu1 %1699 }
 0x528   :  { %1733 = vst.msk [vmem:[%s3725_s10 + $0x70] sm:$0xff] %vm717_vm1, %v1700_v60 }

</bundles_post_ra>
